<compile_context>
chip_gen: v6e
topology: v6e:2x2x1
jax: 0.10.0
libtpu: 0.0.40
codegen_flags: <defaults>
</compile_context>

<pallas_src>
import functools
from typing import NamedTuple

import jax
import jax.numpy as jnp
from jax.experimental import pallas as pl
from jax.experimental.pallas import tpu as pltpu

EPS = 1e-5
WIDTHS = (256, 512, 256, 128)     # BN feature widths, packed in this order
OFFSETS = (0, 256, 768, 1024)     # 128-aligned lane offsets into packed params
OUT_PAD = 128                     # lane-dense padded output width
_WHOLE_BATCH_MAX_ROWS = 1024      # whole-batch path fits v5e's 16 MiB default
_DEFAULT_BATCH_TILE = 512         # tiled path: ~6 MiB/step on every generation


def _round_up(v, m):
    return ((v + m - 1) // m) * m


@functools.lru_cache(maxsize=1)
def _bf16_apply_default():
    """bf16 BN-apply on chips with bf16 VALUs (v6e/v7x); f32 on v5e/older."""
    try:
        kind = jax.devices()[0].device_kind.lower()
    except Exception:  # pragma: no cover - conservative fallback
        return True
    return not any(tag in kind for tag in ("v2", "v3", "v4", "v5"))


# ---------------------------------------------------------------------------
# Packed (pre-processed) parameters — built once, reused every forward.
# ---------------------------------------------------------------------------
class PackedDecoderParams(NamedTuple):
    w1: jax.Array          # bf16 [Din, 256]
    w2: jax.Array          # bf16 [256, 512]
    w3: jax.Array          # bf16 [512, 256]
    w4: jax.Array          # bf16 [256, 128]
    w5_pad: jax.Array      # bf16 [128, OUT_PAD] (zero-padded columns)
    b5_pad: jax.Array      # f32  [1, OUT_PAD]
    gam: jax.Array         # f32  [1, 1152] packed gammas (whole-batch path)
    bet: jax.Array         # f32  [1, 1152] packed betas
    gb: tuple              # 4 x f32 [2, F]: rows (gamma; beta), tiled path


def pack_decoder_params(params):
    """One-time parameter packing (hoisted out of the per-call path)."""
    (w1, _b1, g1, be1, w2, _b2, g2, be2, w3, _b3, g3, be3,
     w4, _b4, g4, be4, w5, b5) = params
    w1b, w2b, w3b, w4b = (w.astype(jnp.bfloat16) for w in (w1, w2, w3, w4))
    w5_pad = jnp.zeros((w5.shape[0], OUT_PAD), jnp.float32)
    w5_pad = w5_pad.at[:, :w5.shape[1]].set(w5).astype(jnp.bfloat16)
    b5_pad = jnp.zeros((1, OUT_PAD), jnp.float32).at[:, :b5.shape[1]].set(b5)
    gam = jnp.concatenate([g1, g2, g3, g4], axis=1)
    bet = jnp.concatenate([be1, be2, be3, be4], axis=1)
    gb = tuple(jnp.concatenate([g, b], axis=0)
               for g, b in ((g1, be1), (g2, be2), (g3, be3), (g4, be4)))
    return PackedDecoderParams(w1b, w2b, w3b, w4b, w5_pad, b5_pad, gam, bet, gb)


# ---------------------------------------------------------------------------
# Shared in-kernel helpers.
# ---------------------------------------------------------------------------
def _bn_scale_shift(stats, gb, n_true):
    """Fold batch stats + affine params into per-feature scale/shift ([1,F])."""
    mean = stats[0:1, :] * (1.0 / n_true)
    var = stats[1:2, :] * (1.0 / n_true) - mean * mean
    scale = gb[0:1, :] * jax.lax.rsqrt(jnp.maximum(var, 0.0) + EPS)
    shift = gb[1:2, :] - mean * scale
    return scale, shift


def _bn_relu_apply(h_bf16, scale, shift, bf16_apply):
    """Fused normalize + affine + ReLU on the [rows, F] tile; returns bf16."""
    if bf16_apply:   # v6e/v7x: bf16 VALU halves the elementwise apply work
        a = h_bf16 * scale.astype(jnp.bfloat16) + shift.astype(jnp.bfloat16)
        return jnp.maximum(a, 0.0)
    a = h_bf16.astype(jnp.float32) * scale + shift
    return jnp.maximum(a, 0.0).astype(jnp.bfloat16)


def _tile_moments(h, tile_rows, n_true, needs_mask):
    """Per-tile [2, F] (sum, sum-of-squares) column moments in f32.

    Zero-padded batch rows are masked out so they never contaminate the
    batch statistics.
    """
    if needs_mask:
        row0 = pl.program_id(0) * tile_rows
        rows = jax.lax.broadcasted_iota(jnp.int32, (h.shape[0], 1), 0) + row0
        h = jnp.where(rows < n_true, h, 0.0)
    s = jnp.sum(h, axis=0, keepdims=True)
    ss = jnp.sum(h * h, axis=0, keepdims=True)
    # TODO(synk): if profiling at large N shows these axis-0 sums saturating
    # the VPU/XLU, move them onto the idle MXU via skinny ones-row dots.
    return jnp.concatenate([s, ss], axis=0)


# ---------------------------------------------------------------------------
# Small-batch path: whole batch resident in VMEM, single fused kernel.
# ---------------------------------------------------------------------------
def _whole_batch_kernel(x_ref, w1_ref, w2_ref, w3_ref, w4_ref, w5_ref,
                        gam_ref, bet_ref, b5_ref, out_ref, *, bf16_apply):
    def bn_relu_layer(h_in, w_ref, off, width):
        # MXU matmul in bf16, f32 accumulation.  Pre-BN biases omitted (they
        # cancel exactly against the batch-mean subtraction).
        h = jnp.dot(h_in, w_ref[...], preferred_element_type=jnp.float32)
        g = gam_ref[:, off:off + width]      # [1, F] f32, 128-aligned slice
        b = bet_ref[:, off:off + width]      # [1, F] f32
        mean = jnp.mean(h, axis=0, keepdims=True)
        var = jnp.mean(h * h, axis=0, keepdims=True) - mean * mean
        scale = g * jax.lax.rsqrt(jnp.maximum(var, 0.0) + EPS)
        shift = b - mean * scale
        return _bn_relu_apply(h.astype(jnp.bfloat16), scale, shift, bf16_apply)

    h = x_ref[...].astype(jnp.bfloat16)
    h = bn_relu_layer(h, w1_ref, OFFSETS[0], WIDTHS[0])
    h = bn_relu_layer(h, w2_ref, OFFSETS[1], WIDTHS[1])
    h = bn_relu_layer(h, w3_ref, OFFSETS[2], WIDTHS[2])
    h = bn_relu_layer(h, w4_ref, OFFSETS[3], WIDTHS[3])
    # Final linear on the zero-padded [128, 128] weight -> lane-dense store.
    out_ref[...] = (jnp.dot(h, w5_ref[...], preferred_element_type=jnp.float32)
                    + b5_ref[...])


def _decoder_forward_whole_batch(x, p, bf16_apply):
    n = x.shape[0]
    operands = (x, p.w1, p.w2, p.w3, p.w4, p.w5_pad, p.gam, p.bet, p.b5_pad)
    vmem = pl.BlockSpec(memory_space=pltpu.MemorySpace.VMEM)
    out = pl.pallas_call(
        functools.partial(_whole_batch_kernel, bf16_apply=bf16_apply),
        out_shape=jax.ShapeDtypeStruct((n, OUT_PAD), jnp.float32),
        in_specs=[vmem] * len(operands),
        out_specs=vmem,
    )(*operands)
    return out[:, :3]


# ---------------------------------------------------------------------------
# Large-batch path: batch-tiled two-phase BN (one pallas_call per layer).
# ---------------------------------------------------------------------------
def _tiled_first_kernel(x_ref, w_ref, h_ref, ps_ref):
    # h1 = x @ w1 ; per-tile partial stats.  Zero-padded x rows give exactly
    # zero h rows, so no masking is needed for this layer's moments.
    h = jnp.dot(x_ref[...].astype(jnp.bfloat16), w_ref[...],
                preferred_element_type=jnp.float32)
    h_ref[...] = h.astype(jnp.bfloat16)
    ps_ref[...] = _tile_moments(h, 0, 0, needs_mask=False)[None]


def _tiled_mid_kernel(h_ref, gb_ref, stats_ref, w_ref, hout_ref, ps_ref,
                      *, n_true, tile, needs_mask, bf16_apply):
    # Apply previous layer's BN+ReLU, next matmul, per-tile partial stats.
    scale, shift = _bn_scale_shift(stats_ref[...], gb_ref[...], n_true)
    a = _bn_relu_apply(h_ref[...], scale, shift, bf16_apply)
    h = jnp.dot(a, w_ref[...], preferred_element_type=jnp.float32)
    hout_ref[...] = h.astype(jnp.bfloat16)
    ps_ref[...] = _tile_moments(h, tile, n_true, needs_mask)[None]


def _tiled_last_kernel(h_ref, gb_ref, stats_ref, w_ref, b_ref, out_ref,
                       *, n_true, bf16_apply):
    scale, shift = _bn_scale_shift(stats_ref[...], gb_ref[...], n_true)
    a = _bn_relu_apply(h_ref[...], scale, shift, bf16_apply)
    out_ref[...] = (jnp.dot(a, w_ref[...], preferred_element_type=jnp.float32)
                    + b_ref[...])


def _decoder_forward_tiled(x, p, bf16_apply, batch_tile):
    n, din = x.shape
    tile = _round_up(max(8, min(batch_tile, _round_up(n, 8))), 8)
    n_pad = _round_up(n, tile)
    needs_mask = (n_pad != n)
    if needs_mask:
        x = jnp.concatenate(
            [x, jnp.zeros((n_pad - n, din), x.dtype)], axis=0)
    num_tiles = n_pad // tile
    # Every grid step is independent (per-tile partial stats, combined in XLA
    # between calls) -> "parallel" batch axis = v7x megacore sharding.
    parallel = pltpu.CompilerParams(dimension_semantics=("parallel",))

    def tiled(cols):
        return pl.BlockSpec((tile, cols), lambda t: (t, 0))

    def resident(a):  # full array, constant block index (fetched once)
        return pl.BlockSpec(a.shape, lambda t: (0, 0))

    def stat_spec(f):
        return pl.BlockSpec((1, 2, f), lambda t: (t, 0, 0))

    # ---- layer 1: x @ w1 --------------------------------------------------
    f = WIDTHS[0]
    h, ps = pl.pallas_call(
        _tiled_first_kernel,
        grid=(num_tiles,),
        out_shape=(jax.ShapeDtypeStruct((n_pad, f), jnp.bfloat16),
                   jax.ShapeDtypeStruct((num_tiles, 2, f), jnp.float32)),
        in_specs=[tiled(din), resident(p.w1)],
        out_specs=(tiled(f), stat_spec(f)),
        compiler_params=parallel,
    )(x, p.w1)
    stats = ps.sum(axis=0)                                  # [2, F] f32, tiny

    # ---- layers 2..4: BN(prev)+ReLU fused into the next matmul ------------
    weights = (p.w1, p.w2, p.w3, p.w4)
    for i in (1, 2, 3):
        f_prev, f = WIDTHS[i - 1], WIDTHS[i]
        w = weights[i]
        h, ps = pl.pallas_call(
            functools.partial(_tiled_mid_kernel, n_true=n, tile=tile,
                              needs_mask=needs_mask, bf16_apply=bf16_apply),
            grid=(num_tiles,),
            out_shape=(jax.ShapeDtypeStruct((n_pad, f), jnp.bfloat16),
                       jax.ShapeDtypeStruct((num_tiles, 2, f), jnp.float32)),
            in_specs=[tiled(f_prev), resident(p.gb[i - 1]), resident(stats),
                      resident(w)],
            out_specs=(tiled(f), stat_spec(f)),
            compiler_params=parallel,
        )(h, p.gb[i - 1], stats, w)
        stats = ps.sum(axis=0)

    # ---- final layer: BN(4)+ReLU + linear to the 128-lane-padded output ---
    out = pl.pallas_call(
        functools.partial(_tiled_last_kernel, n_true=n, bf16_apply=bf16_apply),
        grid=(num_tiles,),
        out_shape=jax.ShapeDtypeStruct((n_pad, OUT_PAD), jnp.float32),
        in_specs=[tiled(WIDTHS[3]), resident(p.gb[3]), resident(stats),
                  resident(p.w5_pad), resident(p.b5_pad)],
        out_specs=tiled(OUT_PAD),
        compiler_params=parallel,
    )(h, p.gb[3], stats, p.w5_pad, p.b5_pad)
    return out[:n, :3]


# ---------------------------------------------------------------------------
# Public forward.
# ---------------------------------------------------------------------------
@functools.partial(jax.jit,
                   static_argnames=("batch_tile", "force_tiled", "bf16_apply"))
def _decoder_forward_jit(x, packed, *, batch_tile, force_tiled, bf16_apply):
    n = x.shape[0]
    if force_tiled or n > _WHOLE_BATCH_MAX_ROWS:
        return _decoder_forward_tiled(x, packed, bf16_apply, batch_tile)
    return _decoder_forward_whole_batch(x, packed, bf16_apply)


def decoder_forward(x, packed, *, batch_tile=_DEFAULT_BATCH_TILE,
                    force_tiled=False, bf16_apply=None):
    """x: [N, zdim + input_dim] f32; packed: PackedDecoderParams."""
    if bf16_apply is None:
        bf16_apply = _bf16_apply_default()
    return _decoder_forward_jit(x, packed, batch_tile=batch_tile,
                                force_tiled=force_tiled, bf16_apply=bf16_apply)


# ---------------------------------------------------------------------------
# Parameter init + references (torch-faithful and precision-matched).
# ---------------------------------------------------------------------------
def init_params(key, zdim, input_dim=3):
    """Deterministic synthetic parameters. Weights stored as [in, out]."""
    dims = [zdim + input_dim, 256, 512, 256, 128, 3]
    params = []
    for i in range(5):
        fan_in, fan_out = dims[i], dims[i + 1]
        key, kw, kb = jax.random.split(key, 3)
        w = jax.random.normal(kw, (fan_in, fan_out), jnp.float32) / jnp.sqrt(fan_in)
        b = 0.01 * jax.random.normal(kb, (1, fan_out), jnp.float32)
        params += [w, b]
        if i < 4:  # BatchNorm affine params for the first four layers
            key, kg, kbe = jax.random.split(key, 3)
            gamma = 1.0 + 0.1 * jax.random.normal(kg, (1, fan_out), jnp.float32)
            beta = 0.1 * jax.random.normal(kbe, (1, fan_out), jnp.float32)
            params += [gamma, beta]
    return tuple(params)


def decoder_ref_f32(x, params):
    """Torch-faithful f32 reference (training-mode BN, pre-BN biases kept)."""
    (w1, b1, g1, be1, w2, b2, g2, be2, w3, b3, g3, be3,
     w4, b4, g4, be4, w5, b5) = params

    def bn_relu(h, g, b):
        mean = jnp.mean(h, axis=0, keepdims=True)
        var = jnp.mean((h - mean) ** 2, axis=0, keepdims=True)
        return jnp.maximum((h - mean) / jnp.sqrt(var + EPS) * g + b, 0.0)

    h = bn_relu(x @ w1 + b1, g1, be1)
    h = bn_relu(h @ w2 + b2, g2, be2)
    h = bn_relu(h @ w3 + b3, g3, be3)
    h = bn_relu(h @ w4 + b4, g4, be4)
    return h @ w5 + b5


def decoder_ref_matched(x, params, bf16_apply=True):
    """Reference mirroring the whole-batch kernel's arithmetic."""
    (w1, _b1, g1, be1, w2, _b2, g2, be2, w3, _b3, g3, be3,
     w4, _b4, g4, be4, w5, b5) = params

    def layer(h, w, g, b):
        h = jnp.dot(h.astype(jnp.bfloat16), w.astype(jnp.bfloat16),
                    preferred_element_type=jnp.float32)
        mean = jnp.mean(h, axis=0, keepdims=True)
        var = jnp.mean(h * h, axis=0, keepdims=True) - mean * mean
        scale = g * jax.lax.rsqrt(jnp.maximum(var, 0.0) + EPS)
        shift = b - mean * scale
        return _bn_relu_apply(h.astype(jnp.bfloat16), scale, shift, bf16_apply)

    h = layer(x, w1, g1, be1)
    h = layer(h, w2, g2, be2)
    h = layer(h, w3, g3, be3)
    h = layer(h, w4, g4, be4)
    return jnp.dot(h.astype(jnp.bfloat16), w5.astype(jnp.bfloat16),
                   preferred_element_type=jnp.float32) + b5


if __name__ == "__main__":
    key = jax.random.PRNGKey(0)
    zdim, input_dim, batch = 29, 3, 64   # x: [64, 32]

    key, kx = jax.random.split(key)
    x = jax.random.normal(kx, (batch, zdim + input_dim), jnp.float32)
    params = init_params(key, zdim, input_dim)

    packed = pack_decoder_params(params)      # one-time packing (hoisted)
    bf16_apply = _bf16_apply_default()

    # Small-batch path: whole batch resident in VMEM, grid=().
    out = jax.block_until_ready(decoder_forward(x, packed))
    assert out.shape == (batch, 3)

    ref_matched = decoder_ref_matched(x, params, bf16_apply=bf16_apply)
    assert jnp.allclose(out, ref_matched, atol=2e-2, rtol=2e-2), \
        "whole-batch kernel: mismatch vs precision-matched reference"

    ref_f32 = decoder_ref_f32(x, params)
    assert jnp.allclose(out, ref_f32, atol=5e-2, rtol=5e-2), \
        "whole-batch kernel: mismatch vs f32 torch-faithful reference"

    # Large-batch (tiled two-phase BN) path, forced at small shapes:
    #   tile=32 -> 2 full tiles; tile=48 -> exercises zero-pad + stat masking.
    for tile_rows in (32, 48):
        out_t = jax.block_until_ready(
            decoder_forward(x, packed, force_tiled=True, batch_tile=tile_rows))
        assert out_t.shape == (batch, 3)
        assert jnp.allclose(out_t, out, atol=2e-2, rtol=2e-2), \
            f"tiled kernel (tile={tile_rows}): mismatch vs whole-batch kernel"
        assert jnp.allclose(out_t, ref_f32, atol=5e-2, rtol=5e-2), \
            f"tiled kernel (tile={tile_rows}): mismatch vs f32 reference"

    print("KERNEL_OK")
</pallas_src>

<mosaic_0001>
module attributes {stable_mosaic.version = 11 : i64} {
  func.func @_whole_batch_kernel(%arg0: memref<64x32xf32, #tpu.memory_space<vmem>>, %arg1: memref<32x256xbf16, #tpu.memory_space<vmem>>, %arg2: memref<256x512xbf16, #tpu.memory_space<vmem>>, %arg3: memref<512x256xbf16, #tpu.memory_space<vmem>>, %arg4: memref<256x128xbf16, #tpu.memory_space<vmem>>, %arg5: memref<128x128xbf16, #tpu.memory_space<vmem>>, %arg6: memref<1x1152xf32, #tpu.memory_space<vmem>>, %arg7: memref<1x1152xf32, #tpu.memory_space<vmem>>, %arg8: memref<1x128xf32, #tpu.memory_space<vmem>>, %arg9: memref<64x128xf32, #tpu.memory_space<vmem>>) attributes {dimension_semantics = [], scalar_prefetch = 0 : i64, scratch_operands = 0 : i64, tpu.core_type = #tpu.core_type<tc>} {
    %c0 = arith.constant 0 : index
    %c0_0 = arith.constant 0 : index
    %0 = vector.load %arg0[%c0, %c0_0] : memref<64x32xf32, #tpu.memory_space<vmem>>, vector<64x32xf32>
    %1 = arith.truncf %0 : vector<64x32xf32> to vector<64x32xbf16>
    %c0_1 = arith.constant 0 : index
    %c0_2 = arith.constant 0 : index
    %2 = vector.load %arg1[%c0_1, %c0_2] : memref<32x256xbf16, #tpu.memory_space<vmem>>, vector<32x256xbf16>
    %cst = arith.constant dense<0.000000e+00> : vector<64x256xf32>
    %3 = tpu.matmul %1, %2, %cst {dimension_numbers = #tpu.dot_dimension_numbers<[1], [0], [0], [1], [0, 0, 1, 1], [], []>} : vector<64x32xbf16>, vector<32x256xbf16>, vector<64x256xf32> -> vector<64x256xf32>
    %c0_3 = arith.constant 0 : index
    %c0_4 = arith.constant 0 : index
    %4 = vector.load %arg6[%c0_3, %c0_4] : memref<1x1152xf32, #tpu.memory_space<vmem>>, vector<1x256xf32>
    %c0_5 = arith.constant 0 : index
    %c0_6 = arith.constant 0 : index
    %5 = vector.load %arg7[%c0_5, %c0_6] : memref<1x1152xf32, #tpu.memory_space<vmem>>, vector<1x256xf32>
    %cst_7 = arith.constant dense<0.000000e+00> : vector<256xf32>
    %6 = vector.multi_reduction <add>, %3, %cst_7 [0] : vector<64x256xf32> to vector<256xf32>
    %7 = vector.shape_cast %6 : vector<256xf32> to vector<1x256xf32>
    %cst_8 = arith.constant 6.400000e+01 : f32
    %8 = vector.broadcast %cst_8 : f32 to vector<1x256xf32>
    %9 = arith.divf %7, %8 : vector<1x256xf32>
    %10 = arith.mulf %3, %3 : vector<64x256xf32>
    %cst_9 = arith.constant dense<0.000000e+00> : vector<256xf32>
    %11 = vector.multi_reduction <add>, %10, %cst_9 [0] : vector<64x256xf32> to vector<256xf32>
    %12 = vector.shape_cast %11 : vector<256xf32> to vector<1x256xf32>
    %cst_10 = arith.constant 6.400000e+01 : f32
    %13 = vector.broadcast %cst_10 : f32 to vector<1x256xf32>
    %14 = arith.divf %12, %13 : vector<1x256xf32>
    %15 = arith.mulf %9, %9 : vector<1x256xf32>
    %16 = arith.subf %14, %15 : vector<1x256xf32>
    %cst_11 = arith.constant 0.000000e+00 : f32
    %17 = vector.broadcast %cst_11 : f32 to vector<1x256xf32>
    %18 = arith.maximumf %16, %17 : vector<1x256xf32>
    %cst_12 = arith.constant 9.99999974E-6 : f32
    %19 = vector.broadcast %cst_12 : f32 to vector<1x256xf32>
    %20 = arith.addf %18, %19 : vector<1x256xf32>
    %21 = math.rsqrt %20 : vector<1x256xf32>
    %22 = arith.mulf %4, %21 : vector<1x256xf32>
    %23 = arith.mulf %9, %22 : vector<1x256xf32>
    %24 = arith.subf %5, %23 : vector<1x256xf32>
    %25 = arith.truncf %3 : vector<64x256xf32> to vector<64x256xbf16>
    %26 = arith.truncf %22 : vector<1x256xf32> to vector<1x256xbf16>
    %27 = vector.broadcast %26 : vector<1x256xbf16> to vector<64x256xbf16>
    %28 = arith.mulf %25, %27 : vector<64x256xbf16>
    %29 = arith.truncf %24 : vector<1x256xf32> to vector<1x256xbf16>
    %30 = vector.broadcast %29 : vector<1x256xbf16> to vector<64x256xbf16>
    %31 = arith.addf %28, %30 : vector<64x256xbf16>
    %cst_13 = arith.constant 0.000000e+00 : bf16
    %32 = vector.broadcast %cst_13 : bf16 to vector<64x256xbf16>
    %33 = arith.maximumf %31, %32 : vector<64x256xbf16>
    %c0_14 = arith.constant 0 : index
    %c0_15 = arith.constant 0 : index
    %34 = vector.load %arg2[%c0_14, %c0_15] : memref<256x512xbf16, #tpu.memory_space<vmem>>, vector<256x512xbf16>
    %cst_16 = arith.constant dense<0.000000e+00> : vector<64x512xf32>
    %35 = tpu.matmul %33, %34, %cst_16 {dimension_numbers = #tpu.dot_dimension_numbers<[1], [0], [0], [1], [0, 0, 1, 1], [], []>} : vector<64x256xbf16>, vector<256x512xbf16>, vector<64x512xf32> -> vector<64x512xf32>
    %c0_17 = arith.constant 0 : index
    %c256 = arith.constant 256 : index
    %36 = vector.load %arg6[%c0_17, %c256] : memref<1x1152xf32, #tpu.memory_space<vmem>>, vector<1x512xf32>
    %c0_18 = arith.constant 0 : index
    %c256_19 = arith.constant 256 : index
    %37 = vector.load %arg7[%c0_18, %c256_19] : memref<1x1152xf32, #tpu.memory_space<vmem>>, vector<1x512xf32>
    %cst_20 = arith.constant dense<0.000000e+00> : vector<512xf32>
    %38 = vector.multi_reduction <add>, %35, %cst_20 [0] : vector<64x512xf32> to vector<512xf32>
    %39 = vector.shape_cast %38 : vector<512xf32> to vector<1x512xf32>
    %cst_21 = arith.constant 6.400000e+01 : f32
    %40 = vector.broadcast %cst_21 : f32 to vector<1x512xf32>
    %41 = arith.divf %39, %40 : vector<1x512xf32>
    %42 = arith.mulf %35, %35 : vector<64x512xf32>
    %cst_22 = arith.constant dense<0.000000e+00> : vector<512xf32>
    %43 = vector.multi_reduction <add>, %42, %cst_22 [0] : vector<64x512xf32> to vector<512xf32>
    %44 = vector.shape_cast %43 : vector<512xf32> to vector<1x512xf32>
    %cst_23 = arith.constant 6.400000e+01 : f32
    %45 = vector.broadcast %cst_23 : f32 to vector<1x512xf32>
    %46 = arith.divf %44, %45 : vector<1x512xf32>
    %47 = arith.mulf %41, %41 : vector<1x512xf32>
    %48 = arith.subf %46, %47 : vector<1x512xf32>
    %cst_24 = arith.constant 0.000000e+00 : f32
    %49 = vector.broadcast %cst_24 : f32 to vector<1x512xf32>
    %50 = arith.maximumf %48, %49 : vector<1x512xf32>
    %cst_25 = arith.constant 9.99999974E-6 : f32
    %51 = vector.broadcast %cst_25 : f32 to vector<1x512xf32>
    %52 = arith.addf %50, %51 : vector<1x512xf32>
    %53 = math.rsqrt %52 : vector<1x512xf32>
    %54 = arith.mulf %36, %53 : vector<1x512xf32>
    %55 = arith.mulf %41, %54 : vector<1x512xf32>
    %56 = arith.subf %37, %55 : vector<1x512xf32>
    %57 = arith.truncf %35 : vector<64x512xf32> to vector<64x512xbf16>
    %58 = arith.truncf %54 : vector<1x512xf32> to vector<1x512xbf16>
    %59 = vector.broadcast %58 : vector<1x512xbf16> to vector<64x512xbf16>
    %60 = arith.mulf %57, %59 : vector<64x512xbf16>
    %61 = arith.truncf %56 : vector<1x512xf32> to vector<1x512xbf16>
    %62 = vector.broadcast %61 : vector<1x512xbf16> to vector<64x512xbf16>
    %63 = arith.addf %60, %62 : vector<64x512xbf16>
    %cst_26 = arith.constant 0.000000e+00 : bf16
    %64 = vector.broadcast %cst_26 : bf16 to vector<64x512xbf16>
    %65 = arith.maximumf %63, %64 : vector<64x512xbf16>
    %c0_27 = arith.constant 0 : index
    %c0_28 = arith.constant 0 : index
    %66 = vector.load %arg3[%c0_27, %c0_28] : memref<512x256xbf16, #tpu.memory_space<vmem>>, vector<512x256xbf16>
    %cst_29 = arith.constant dense<0.000000e+00> : vector<64x256xf32>
    %67 = tpu.matmul %65, %66, %cst_29 {dimension_numbers = #tpu.dot_dimension_numbers<[1], [0], [0], [1], [0, 0, 1, 1], [], []>} : vector<64x512xbf16>, vector<512x256xbf16>, vector<64x256xf32> -> vector<64x256xf32>
    %c0_30 = arith.constant 0 : index
    %c768 = arith.constant 768 : index
    %68 = vector.load %arg6[%c0_30, %c768] : memref<1x1152xf32, #tpu.memory_space<vmem>>, vector<1x256xf32>
    %c0_31 = arith.constant 0 : index
    %c768_32 = arith.constant 768 : index
    %69 = vector.load %arg7[%c0_31, %c768_32] : memref<1x1152xf32, #tpu.memory_space<vmem>>, vector<1x256xf32>
    %cst_33 = arith.constant dense<0.000000e+00> : vector<256xf32>
    %70 = vector.multi_reduction <add>, %67, %cst_33 [0] : vector<64x256xf32> to vector<256xf32>
    %71 = vector.shape_cast %70 : vector<256xf32> to vector<1x256xf32>
    %cst_34 = arith.constant 6.400000e+01 : f32
    %72 = vector.broadcast %cst_34 : f32 to vector<1x256xf32>
    %73 = arith.divf %71, %72 : vector<1x256xf32>
    %74 = arith.mulf %67, %67 : vector<64x256xf32>
    %cst_35 = arith.constant dense<0.000000e+00> : vector<256xf32>
    %75 = vector.multi_reduction <add>, %74, %cst_35 [0] : vector<64x256xf32> to vector<256xf32>
    %76 = vector.shape_cast %75 : vector<256xf32> to vector<1x256xf32>
    %cst_36 = arith.constant 6.400000e+01 : f32
    %77 = vector.broadcast %cst_36 : f32 to vector<1x256xf32>
    %78 = arith.divf %76, %77 : vector<1x256xf32>
    %79 = arith.mulf %73, %73 : vector<1x256xf32>
    %80 = arith.subf %78, %79 : vector<1x256xf32>
    %cst_37 = arith.constant 0.000000e+00 : f32
    %81 = vector.broadcast %cst_37 : f32 to vector<1x256xf32>
    %82 = arith.maximumf %80, %81 : vector<1x256xf32>
    %cst_38 = arith.constant 9.99999974E-6 : f32
    %83 = vector.broadcast %cst_38 : f32 to vector<1x256xf32>
    %84 = arith.addf %82, %83 : vector<1x256xf32>
    %85 = math.rsqrt %84 : vector<1x256xf32>
    %86 = arith.mulf %68, %85 : vector<1x256xf32>
    %87 = arith.mulf %73, %86 : vector<1x256xf32>
    %88 = arith.subf %69, %87 : vector<1x256xf32>
    %89 = arith.truncf %67 : vector<64x256xf32> to vector<64x256xbf16>
    %90 = arith.truncf %86 : vector<1x256xf32> to vector<1x256xbf16>
    %91 = vector.broadcast %90 : vector<1x256xbf16> to vector<64x256xbf16>
    %92 = arith.mulf %89, %91 : vector<64x256xbf16>
    %93 = arith.truncf %88 : vector<1x256xf32> to vector<1x256xbf16>
    %94 = vector.broadcast %93 : vector<1x256xbf16> to vector<64x256xbf16>
    %95 = arith.addf %92, %94 : vector<64x256xbf16>
    %cst_39 = arith.constant 0.000000e+00 : bf16
    %96 = vector.broadcast %cst_39 : bf16 to vector<64x256xbf16>
    %97 = arith.maximumf %95, %96 : vector<64x256xbf16>
    %c0_40 = arith.constant 0 : index
    %c0_41 = arith.constant 0 : index
    %98 = vector.load %arg4[%c0_40, %c0_41] : memref<256x128xbf16, #tpu.memory_space<vmem>>, vector<256x128xbf16>
    %cst_42 = arith.constant dense<0.000000e+00> : vector<64x128xf32>
    %99 = tpu.matmul %97, %98, %cst_42 {dimension_numbers = #tpu.dot_dimension_numbers<[1], [0], [0], [1], [0, 0, 1, 1], [], []>} : vector<64x256xbf16>, vector<256x128xbf16>, vector<64x128xf32> -> vector<64x128xf32>
    %c0_43 = arith.constant 0 : index
    %c1024 = arith.constant 1024 : index
    %100 = vector.load %arg6[%c0_43, %c1024] : memref<1x1152xf32, #tpu.memory_space<vmem>>, vector<1x128xf32>
    %c0_44 = arith.constant 0 : index
    %c1024_45 = arith.constant 1024 : index
    %101 = vector.load %arg7[%c0_44, %c1024_45] : memref<1x1152xf32, #tpu.memory_space<vmem>>, vector<1x128xf32>
    %cst_46 = arith.constant dense<0.000000e+00> : vector<128xf32>
    %102 = vector.multi_reduction <add>, %99, %cst_46 [0] : vector<64x128xf32> to vector<128xf32>
    %103 = vector.shape_cast %102 : vector<128xf32> to vector<1x128xf32>
    %cst_47 = arith.constant 6.400000e+01 : f32
    %104 = vector.broadcast %cst_47 : f32 to vector<1x128xf32>
    %105 = arith.divf %103, %104 : vector<1x128xf32>
    %106 = arith.mulf %99, %99 : vector<64x128xf32>
    %cst_48 = arith.constant dense<0.000000e+00> : vector<128xf32>
    %107 = vector.multi_reduction <add>, %106, %cst_48 [0] : vector<64x128xf32> to vector<128xf32>
    %108 = vector.shape_cast %107 : vector<128xf32> to vector<1x128xf32>
    %cst_49 = arith.constant 6.400000e+01 : f32
    %109 = vector.broadcast %cst_49 : f32 to vector<1x128xf32>
    %110 = arith.divf %108, %109 : vector<1x128xf32>
    %111 = arith.mulf %105, %105 : vector<1x128xf32>
    %112 = arith.subf %110, %111 : vector<1x128xf32>
    %cst_50 = arith.constant 0.000000e+00 : f32
    %113 = vector.broadcast %cst_50 : f32 to vector<1x128xf32>
    %114 = arith.maximumf %112, %113 : vector<1x128xf32>
    %cst_51 = arith.constant 9.99999974E-6 : f32
    %115 = vector.broadcast %cst_51 : f32 to vector<1x128xf32>
    %116 = arith.addf %114, %115 : vector<1x128xf32>
    %117 = math.rsqrt %116 : vector<1x128xf32>
    %118 = arith.mulf %100, %117 : vector<1x128xf32>
    %119 = arith.mulf %105, %118 : vector<1x128xf32>
    %120 = arith.subf %101, %119 : vector<1x128xf32>
    %121 = arith.truncf %99 : vector<64x128xf32> to vector<64x128xbf16>
    %122 = arith.truncf %118 : vector<1x128xf32> to vector<1x128xbf16>
    %123 = vector.broadcast %122 : vector<1x128xbf16> to vector<64x128xbf16>
    %124 = arith.mulf %121, %123 : vector<64x128xbf16>
    %125 = arith.truncf %120 : vector<1x128xf32> to vector<1x128xbf16>
    %126 = vector.broadcast %125 : vector<1x128xbf16> to vector<64x128xbf16>
    %127 = arith.addf %124, %126 : vector<64x128xbf16>
    %cst_52 = arith.constant 0.000000e+00 : bf16
    %128 = vector.broadcast %cst_52 : bf16 to vector<64x128xbf16>
    %129 = arith.maximumf %127, %128 : vector<64x128xbf16>
    %c0_53 = arith.constant 0 : index
    %c0_54 = arith.constant 0 : index
    %130 = vector.load %arg5[%c0_53, %c0_54] : memref<128x128xbf16, #tpu.memory_space<vmem>>, vector<128x128xbf16>
    %cst_55 = arith.constant dense<0.000000e+00> : vector<64x128xf32>
    %131 = tpu.matmul %129, %130, %cst_55 {dimension_numbers = #tpu.dot_dimension_numbers<[1], [0], [0], [1], [0, 0, 1, 1], [], []>} : vector<64x128xbf16>, vector<128x128xbf16>, vector<64x128xf32> -> vector<64x128xf32>
    %c0_56 = arith.constant 0 : index
    %c0_57 = arith.constant 0 : index
    %132 = vector.load %arg8[%c0_56, %c0_57] : memref<1x128xf32, #tpu.memory_space<vmem>>, vector<1x128xf32>
    %133 = vector.broadcast %132 : vector<1x128xf32> to vector<64x128xf32>
    %134 = arith.addf %131, %133 : vector<64x128xf32>
    %c0_58 = arith.constant 0 : index
    %c0_59 = arith.constant 0 : index
    %135 = vector.load %arg9[%c0_58, %c0_59] : memref<64x128xf32, #tpu.memory_space<vmem>>, vector<64x128xf32>
    tpu.vector_store %arg9[%c0_58, %c0_59], %134 {strides = array<i32>} : memref<64x128xf32, #tpu.memory_space<vmem>>, vector<64x128xf32>,
    return
  }
}

</mosaic_0001>

<bundles_post_ra>
// kernel: _decoder_forward_jit.1
= control target key start
LH: loop header
LB: loop body
LE: loop exit
PB: predicated region body
PF: predicated region fallthrough
CT: control target
= control target key end

     0   :  { %14 = vsyncpa [#allocation3], 0  ;;  %s3873_s0 = inlined_call_operand.vmem [shape: f32[64,32], index: 0, kind: input, shape index: {}]   ;;  %s3874_s1 = inlined_call_operand.vmem [shape: bf16[32,256], index: 1, kind: input, shape index: {}]   ;;  %s3875_s2 = inlined_call_operand.hbm [shape: bf16[256,512], index: 2, kind: input, shape index: {}]   ;;  %s3876_s3 = inlined_call_operand.hbm [shape: bf16[512,256], index: 3, kind: input, shape index: {}]   ;;  %s3877_s4 = inlined_call_operand.hbm [shape: bf16[256,128], index: 4, kind: input, shape index: {}]   ;;  %s3878_s5 = inlined_call_operand.vmem [shape: bf16[128,128], index: 5, kind: input, shape index: {}]   ;;  %s3879_s6 = inlined_call_operand.vmem [shape: f32[1,1152], index: 6, kind: input, shape index: {}]   ;;  %s3880_s7 = inlined_call_operand.hbm [shape: f32[1,1152], index: 7, kind: input, shape index: {}]   ;;  %s3881_s8 = inlined_call_operand.vmem [shape: f32[1,128], index: 8, kind: input, shape index: {}]   ;;  %s3882_s9 = inlined_call_operand.vmem [shape: f32[64,128], index: 9, kind: output, shape index: {}]  }
   0x1   :  { %15 = vsyncpa [#allocation5], 0 }
   0x2   :  { %16 = vsyncpa [#allocation8], 0  ;;  %s3086_s30 = smov [#allocation4]  }
   0x3   :  { %s38_s10 = sshll.u32 %s3086_s30, 4  ;;  %s39_s10 = int_to_ptr.vmem [resolvable:$true] %s38_s10 }
   0x4   :  { %s3008_s11 = scalar_lea.vmem %s39_s10, 8192  ;;  %p3013_p1 = scmp.lt.s32.totalorder %s39_s10, %s39_s10 }
   0x5   :  { %p3009_p0 = scmp.ne.s32.totalorder %s39_s10, %s3008_s11  ;;  %p3014_p2 = scmp.lt.s32.totalorder %s3008_s11, %s3008_s11 }
   0x7   :  { %p3015_p3 = por %p3014_p2, %p3013_p1 }
   0x9   :  { %p3016_p4 = pnand %p3015_p3, %p3009_p0 }
   0xb   :  { %3019 = shalt.err (!%p3016_p4)
}
   0xc   :  { %s3087_s12 = smov 128   ;;  %s3088_s13 = smov 8  }
   0xd   :  { %44 = dma.hbm_to_vmem [thread:$0]  %s3876_s3, 8192, %s39_s10, [#allocation5], %s3087_s12, %s3087_s12, %s3088_s13  }
   0xe   :  { %s3089_s16 = smov [#allocation2]  }
   0xf   :  { %s26_s17 = sshll.u32 %s3089_s16, 4  ;;  %s27_s17 = int_to_ptr.vmem [resolvable:$true] %s26_s17 }
  0x10   :  { %s3028_s18 = scalar_lea.vmem %s27_s17, 8192  ;;  %p3033_p6 = scmp.lt.s32.totalorder %s27_s17, %s27_s17 }
  0x11   :  { %p3029_p5 = scmp.ne.s32.totalorder %s27_s17, %s3028_s18  ;;  %p3034_p7 = scmp.lt.s32.totalorder %s3028_s18, %s3028_s18 }
  0x13   :  { %p3035_p8 = por %p3034_p7, %p3033_p6 }
  0x15   :  { %p3036_p9 = pnand %p3035_p8, %p3029_p5 }
  0x17   :  { %3039 = shalt.err (!%p3036_p9)
}
  0x18   :  { %s3090_s19 = smov 256   ;;  %s3091_s20 = smov 16  }
  0x19   :  { %32 = dma.hbm_to_vmem [thread:$0]  %s3875_s2, 8192, %s27_s17, [#allocation3], %s3090_s19, %s3090_s19, %s3091_s20  }
  0x1a   :  { %s3092_s23 = smov [#allocation6]  }
  0x1b   :  { %s50_s24 = sshll.u32 %s3092_s23, 4  ;;  %s51_s24 = int_to_ptr.vmem [resolvable:$true] %s50_s24 }
  0x1c   :  { %s3048_s3 = scalar_lea.vmem %s51_s24, 2048  ;;  %p3053_p11 = scmp.lt.s32.totalorder %s51_s24, %s51_s24 }
  0x1d   :  { %p3049_p10 = scmp.ne.s32.totalorder %s51_s24, %s3048_s3  ;;  %p3054_p12 = scmp.lt.s32.totalorder %s3048_s3, %s3048_s3 }
  0x1f   :  { %p3055_p13 = por %p3054_p12, %p3053_p11 }
  0x21   :  { %p3056_p0 = pnand %p3055_p13, %p3049_p10 }
  0x23   :  { %3059 = shalt.err (!%p3056_p0)
}
  0x24   :  { %s3093_s25 = smov 64   ;;  %s3094_s26 = smov 4  }
  0x25   :  { %56 = dma.hbm_to_vmem [thread:$0]  %s3877_s4, 2048, %s51_s24, [#allocation5], %s3093_s25, %s3093_s25, %s3094_s26  }
  0x26   :  { %s3095_s29 = smov [#allocation7]  }
  0x27   :  { %s67_s30 = sshll.u32 %s3095_s29, 4  ;;  %s68_s30 = int_to_ptr.vmem [resolvable:$true] %s67_s30 }
  0x28   :  { %s3068_s2 = scalar_lea.vmem %s68_s30, 144  ;;  %s3072_s10 = scalar_lea.vmem %s68_s30, 160 }
  0x29   :  { %p3069_p1 = scmp.ne.s32.totalorder %s68_s30, %s3068_s2  ;;  %p3073_p2 = scmp.lt.s32.totalorder %s68_s30, %s68_s30 }
  0x2a   :  { %p3074_p3 = scmp.lt.s32.totalorder %s3072_s10, %s3068_s2 }
  0x2c   :  { %p3075_p4 = por %p3074_p3, %p3073_p2 }
  0x2e   :  { %p3076_p5 = pnand %p3075_p4, %p3069_p1 }
  0x30   :  { %3079 = shalt.err (!%p3076_p5)
}
  0x31   :  { %70 = dma.hbm_to_vmem [thread:$0]  %s3880_s7, 144, %s68_s30, [#allocation8]  }
  0x32   :  { %3080 = dma.done.wait [#allocation3], 8192  }
  0x33   :  { %3081 = vsyncadd [#allocation3], 4294959104 }
  0x34   :  { %3082 = dma.done.wait [#allocation5], 10240  }
  0x35   :  { %3083 = vsyncadd [#allocation5], 4294957056 }
  0x36   :  { %3084 = dma.done.wait [#allocation8], 144  }
  0x37   :  { %3085 = vsyncadd [#allocation8], 4294967152  ;;  %v3883_v0 = vmov 0   ;;  %v2760_v1 = vld [vmem:[%s3874_s1 + $0x14] ss:$8 sps:$4 sm:$0xff]   ;;  %v86_v5 = vld [vmem:[%s3873_s0] sm:$0xff] }
  0x38   :  { %167 = vmatprep.mubr.bf16.mxu0 %v3883_v0  ;;  %v2762_v2 = vld [vmem:[%s3874_s1 + $0x10] ss:$8 sps:$4 sm:$0xff]   ;;  %147 = vmatprep.subr.bf16.mxu0 %v2760_v1  ;;  %v2763_v3 = vld [vmem:[%s3874_s1 + $0x4] ss:$8 sps:$4 sm:$0xff]   ;;  %v2765_v4 = vld [vmem:[%s3874_s1] ss:$8 sps:$4 sm:$0xff]  }
  0x39   :  { %148 = vmatpush1.bf16.msra.mxu0 %v2762_v2  ;;  %v87_v6 = vld [vmem:[%s3873_s0 + $0x8] sm:$0xff]  ;;  %vm122_vm0 = vcmask 261120   ;;  %v88_v8 = vld [vmem:[%s3873_s0 + $0x10] sm:$0xff]  ;;  %v89_v9 = vld [vmem:[%s3873_s0 + $0x18] sm:$0xff] }
  0x3a   :  { %149 = vmatprep.subr.bf16.mxu0 %v2763_v3  ;;  %v94_v7 = vpack.c.bf16 %v87_v6, %v86_v5  ;;  %v95_v10 = vpack.c.bf16 %v89_v9, %v88_v8  ;;  %v90_v11 = vld [vmem:[%s3873_s0 + $0x20] sm:$0xff]  ;;  %v91_v12 = vld [vmem:[%s3873_s0 + $0x28] sm:$0xff]  ;;  %v92_v14 = vld [vmem:[%s3873_s0 + $0x30] sm:$0xff] }
  0x3b   :  { %v96_v13 = vpack.c.bf16 %v91_v12, %v90_v11  ;;  %v93_v15 = vld [vmem:[%s3873_s0 + $0x38] sm:$0xff]  ;;  %v2766_v17 = vld [vmem:[#allocation2 + $0xe4] ss:$16 sps:$4 sm:$0xff]   ;;  %v2771_v20 = vld [vmem:[#allocation2 + $0xe0] ss:$16 sps:$4 sm:$0xff]  }
  0x3c   :  { %v97_v16 = vpack.c.bf16 %v93_v15, %v92_v14  ;;  %v2770_v18 = vld [vmem:[#allocation2 + $0xec] ss:$16 sps:$4 sm:$0xff]   ;;  %v2768_v19 = vld [vmem:[#allocation2 + $0xe8] ss:$16 sps:$4 sm:$0xff]   ;;  %803 = vmatprep.subr.bf16.mxu1 %v2766_v17  ;;  %v2772_v21 = vld [vmem:[#allocation2 + $0xc4] ss:$16 sps:$4 sm:$0xff]  }
  0x3d   :  { %150 = vmatpush1.bf16.msra.mxu0 %v2765_v4  ;;  %804 = vmatpush1.bf16.msra.mxu1 %v2771_v20  ;;  %v2776_v22 = vld [vmem:[#allocation2 + $0xcc] ss:$16 sps:$4 sm:$0xff]   ;;  %v2774_v23 = vld [vmem:[#allocation2 + $0xc8] ss:$16 sps:$4 sm:$0xff]   ;;  %v2777_v24 = vld [vmem:[#allocation2 + $0xc0] ss:$16 sps:$4 sm:$0xff]  }
  0x3e   :  { %876 = vmatprep.subr.bf16.mxu0 %v2770_v18  ;;  %805 = vmatprep.subr.bf16.mxu1 %v2772_v21  ;;  %v2778_v25 = vld [vmem:[#allocation2 + $0xa4] ss:$16 sps:$4 sm:$0xff]   ;;  %v2782_v26 = vld [vmem:[#allocation2 + $0xac] ss:$16 sps:$4 sm:$0xff]   ;;  %v2780_v27 = vld [vmem:[#allocation2 + $0xa8] ss:$16 sps:$4 sm:$0xff]  }
  0x3f   :  { %v2783_v28 = vld [vmem:[#allocation2 + $0xa0] ss:$16 sps:$4 sm:$0xff]   ;;  %v2784_v29 = vld [vmem:[#allocation2 + $0x84] ss:$16 sps:$4 sm:$0xff]   ;;  %v2788_v30 = vld [vmem:[#allocation2 + $0x8c] ss:$16 sps:$4 sm:$0xff]  }
  0x40   :  { %2515 = vmatmul.mubr.msk.bf16.vlgmr.msra.gmra.mxu0 %vm122_vm0, %v94_v7  ;;  %v2786_v31 = vld [vmem:[#allocation2 + $0x88] ss:$16 sps:$4 sm:$0xff]   ;;  %v2789_v32 = vld [vmem:[#allocation2 + $0x80] ss:$16 sps:$4 sm:$0xff]   ;;  %v2790_v33 = vld [vmem:[#allocation2 + $0x64] ss:$16 sps:$4 sm:$0xff]  }
  0x41   :  { %177 = vmatprep.mubr.bf16.mxu0 %v3883_v0  ;;  %877 = vmatpush1.bf16.msra.mxu0 %v2768_v19  ;;  %v2794_v34 = vld [vmem:[#allocation2 + $0x6c] ss:$16 sps:$4 sm:$0xff]   ;;  %v2792_v35 = vld [vmem:[#allocation2 + $0x68] ss:$16 sps:$4 sm:$0xff]   ;;  %v2795_v36 = vld [vmem:[#allocation2 + $0x60] ss:$16 sps:$4 sm:$0xff]  }
  0x42   :  { %878 = vmatprep.subr.bf16.mxu0 %v2776_v22  ;;  %806 = vmatpush1.bf16.msra.mxu1 %v2777_v24  ;;  %v2796_v37 = vld [vmem:[#allocation2 + $0x44] ss:$16 sps:$4 sm:$0xff]   ;;  %v2800_v38 = vld [vmem:[#allocation2 + $0x4c] ss:$16 sps:$4 sm:$0xff]   ;;  %v2798_v39 = vld [vmem:[#allocation2 + $0x48] ss:$16 sps:$4 sm:$0xff]  }
  0x43   :  { %807 = vmatprep.subr.bf16.mxu1 %v2778_v25  ;;  %v2801_v40 = vld [vmem:[#allocation2 + $0x40] ss:$16 sps:$4 sm:$0xff]   ;;  %v2802_v41 = vld [vmem:[#allocation2 + $0x24] ss:$16 sps:$4 sm:$0xff]   ;;  %v2806_v42 = vld [vmem:[#allocation2 + $0x2c] ss:$16 sps:$4 sm:$0xff]  }
  0x44   :  { %v2804_v43 = vld [vmem:[#allocation2 + $0x28] ss:$16 sps:$4 sm:$0xff]   ;;  %v2807_v44 = vld [vmem:[#allocation2 + $0x20] ss:$16 sps:$4 sm:$0xff]   ;;  %v2808_v45 = vld [vmem:[#allocation2 + $0x4] ss:$16 sps:$4 sm:$0xff]  }
  0x45   :  { %879 = vmatpush1.bf16.msra.mxu0 %v2774_v23  ;;  %v2812_v46 = vld [vmem:[#allocation2 + $0xc] ss:$16 sps:$4 sm:$0xff]   ;;  %v2810_v47 = vld [vmem:[#allocation2 + $0x8] ss:$16 sps:$4 sm:$0xff]   ;;  %v2813_v48 = vld [vmem:[#allocation2] ss:$16 sps:$4 sm:$0xff]  }
  0x46   :  { %880 = vmatprep.subr.bf16.mxu0 %v2782_v26  ;;  %808 = vmatpush1.bf16.msra.mxu1 %v2783_v28  ;;  %v2814_v49 = vld [vmem:[#allocation2 + $0x1e4] ss:$16 sps:$4 sm:$0xff]   ;;  %v2818_v50 = vld [vmem:[#allocation2 + $0x1ec] ss:$16 sps:$4 sm:$0xff]   ;;  %v2816_v51 = vld [vmem:[#allocation2 + $0x1e8] ss:$16 sps:$4 sm:$0xff]  }
  0x47   :  { %809 = vmatprep.subr.bf16.mxu1 %v2784_v29  ;;  %v2819_v52 = vld [vmem:[#allocation2 + $0x1e0] ss:$16 sps:$4 sm:$0xff]   ;;  %v2820_v53 = vld [vmem:[#allocation2 + $0x1c4] ss:$16 sps:$4 sm:$0xff]   ;;  %v2824_v54 = vld [vmem:[#allocation2 + $0x1cc] ss:$16 sps:$4 sm:$0xff]  }
  0x48   :  { %2516 = vmatmul.mubr.msk.bf16.gmra.mxu0 %vm122_vm0, %v95_v10  ;;  %v2822_v55 = vld [vmem:[#allocation2 + $0x1c8] ss:$16 sps:$4 sm:$0xff]   ;;  %v2825_v56 = vld [vmem:[#allocation2 + $0x1c0] ss:$16 sps:$4 sm:$0xff]   ;;  %v2826_v57 = vld [vmem:[#allocation2 + $0x1a4] ss:$16 sps:$4 sm:$0xff]  }
  0x49   :  { %187 = vmatprep.mubr.bf16.mxu0 %v3883_v0  ;;  %881 = vmatpush1.bf16.msra.mxu0 %v2780_v27  ;;  %v2830_v58 = vld [vmem:[#allocation2 + $0x1ac] ss:$16 sps:$4 sm:$0xff]   ;;  %v2828_v59 = vld [vmem:[#allocation2 + $0x1a8] ss:$16 sps:$4 sm:$0xff]   ;;  %v2831_v60 = vld [vmem:[#allocation2 + $0x1a0] ss:$16 sps:$4 sm:$0xff]  }
  0x4a   :  { %882 = vmatprep.subr.bf16.mxu0 %v2788_v30  ;;  %810 = vmatpush1.bf16.msra.mxu1 %v2789_v32  ;;  %v2832_v61 = vld [vmem:[#allocation2 + $0x184] ss:$16 sps:$4 sm:$0xff]   ;;  %v2836_v62 = vld [vmem:[#allocation2 + $0x18c] ss:$16 sps:$4 sm:$0xff]   ;;  %v2834_v63 = vld [vmem:[#allocation2 + $0x188] ss:$16 sps:$4 sm:$0xff]  }
  0x4b   :  { %811 = vmatprep.subr.bf16.mxu1 %v2790_v33  ;;  %v2837_v1 = vld [vmem:[#allocation2 + $0x180] ss:$16 sps:$4 sm:$0xff]   ;;  %v2838_v2 = vld [vmem:[#allocation2 + $0x164] ss:$16 sps:$4 sm:$0xff]   ;;  %v2840_v3 = vld [vmem:[#allocation2 + $0x168] ss:$16 sps:$4 sm:$0xff]  }
  0x4c   :  { %v2842_v4 = vld [vmem:[#allocation2 + $0x16c] ss:$16 sps:$4 sm:$0xff]   ;;  %v2843_v5 = vld [vmem:[#allocation2 + $0x160] ss:$16 sps:$4 sm:$0xff]   ;;  %v2844_v6 = vld [vmem:[#allocation2 + $0x144] ss:$16 sps:$4 sm:$0xff]  }
  0x4d   :  { %883 = vmatpush1.bf16.msra.mxu0 %v2786_v31  ;;  %v2848_v7 = vld [vmem:[#allocation2 + $0x14c] ss:$16 sps:$4 sm:$0xff]   ;;  %v2846_v8 = vld [vmem:[#allocation2 + $0x148] ss:$16 sps:$4 sm:$0xff]   ;;  %v2849_v9 = vld [vmem:[#allocation2 + $0x140] ss:$16 sps:$4 sm:$0xff]  }
  0x4e   :  { %884 = vmatprep.subr.bf16.mxu0 %v2794_v34  ;;  %812 = vmatpush1.bf16.msra.mxu1 %v2795_v36  ;;  %v2850_v10 = vld [vmem:[#allocation2 + $0x124] ss:$16 sps:$4 sm:$0xff]   ;;  %v2854_v11 = vld [vmem:[#allocation2 + $0x12c] ss:$16 sps:$4 sm:$0xff]   ;;  %v2852_v12 = vld [vmem:[#allocation2 + $0x128] ss:$16 sps:$4 sm:$0xff]  }
  0x4f   :  { %813 = vmatprep.subr.bf16.mxu1 %v2796_v37  ;;  %v2856_v14 = vld [vmem:[#allocation2 + $0x104] ss:$16 sps:$4 sm:$0xff]   ;;  %v2860_v15 = vld [vmem:[#allocation2 + $0x10c] ss:$16 sps:$4 sm:$0xff]   ;;  %v2861_v17 = vld [vmem:[#allocation2 + $0x100] ss:$16 sps:$4 sm:$0xff]  }
  0x50   :  { %2517 = vmatmul.mubr.msk.bf16.gmra.mxu0 %vm122_vm0, %v96_v13  ;;  %v2855_v13 = vld [vmem:[#allocation2 + $0x120] ss:$16 sps:$4 sm:$0xff]  }
  0x51   :  { %197 = vmatprep.mubr.bf16.mxu0 %v3883_v0  ;;  %885 = vmatpush1.bf16.msra.mxu0 %v2792_v35 }
  0x52   :  { %886 = vmatprep.subr.bf16.mxu0 %v2800_v38  ;;  %814 = vmatpush1.bf16.msra.mxu1 %v2801_v40 }
  0x53   :  { %815 = vmatprep.subr.bf16.mxu1 %v2802_v41 }
  0x55   :  { %887 = vmatpush1.bf16.msra.mxu0 %v2798_v39 }
  0x56   :  { %888 = vmatprep.subr.bf16.mxu0 %v2806_v42  ;;  %816 = vmatpush1.bf16.msra.mxu1 %v2807_v44 }
  0x57   :  { %817 = vmatprep.subr.bf16.mxu1 %v2808_v45 }
  0x58   :  { %2518 = vmatmul.mubr.msk.bf16.gmra.mxu0 %vm122_vm0, %v97_v16  ;;  %v2858_v16 = vld [vmem:[#allocation2 + $0x108] ss:$16 sps:$4 sm:$0xff]  }
  0x59   :  { %889 = vmatpush1.bf16.msra.mxu0 %v2804_v43 }
  0x5a   :  { %890 = vmatprep.subr.bf16.mxu0 %v2812_v46  ;;  %818 = vmatpush1.bf16.msra.mxu1 %v2813_v48 }
  0x5b   :  { %819 = vmatprep.subr.bf16.mxu1 %v2814_v49 }
  0x5d   :  { %891 = vmatpush1.bf16.msra.mxu0 %v2810_v47 }
  0x5e   :  { %892 = vmatprep.subr.bf16.mxu0 %v2818_v50  ;;  %820 = vmatpush2.bf16.msra.mxu1 %v2819_v52 }
  0x5f   :  { %821 = vmatprep.subr.bf16.mxu1 %v2820_v53 }
  0x61   :  { %893 = vmatpush2.bf16.msra.mxu0 %v2816_v51 }
  0x62   :  { %894 = vmatprep.subr.bf16.mxu0 %v2824_v54  ;;  %822 = vmatpush2.bf16.msra.mxu1 %v2825_v56 }
  0x63   :  { %823 = vmatprep.subr.bf16.mxu1 %v2826_v57 }
  0x65   :  { %895 = vmatpush2.bf16.msra.mxu0 %v2822_v55 }
  0x66   :  { %896 = vmatprep.subr.bf16.mxu0 %v2830_v58  ;;  %824 = vmatpush2.bf16.msra.mxu1 %v2831_v60 }
  0x67   :  { %825 = vmatprep.subr.bf16.mxu1 %v2832_v61 }
  0x69   :  { %897 = vmatpush2.bf16.msra.mxu0 %v2828_v59 }
  0x6a   :  { %898 = vmatprep.subr.bf16.mxu0 %v2836_v62  ;;  %826 = vmatpush2.bf16.msra.mxu1 %v2837_v1 }
  0x6b   :  { %827 = vmatprep.subr.bf16.mxu1 %v2838_v2 }
  0x6d   :  { %899 = vmatpush2.bf16.msra.mxu0 %v2834_v63 }
  0x6e   :  { %900 = vmatprep.subr.bf16.mxu0 %v2842_v4  ;;  %828 = vmatpush2.bf16.msra.mxu1 %v2843_v5 }
  0x6f   :  { %829 = vmatprep.subr.bf16.mxu1 %v2844_v6 }
  0x71   :  { %901 = vmatpush2.bf16.msra.mxu0 %v2840_v3 }
  0x72   :  { %902 = vmatprep.subr.bf16.mxu0 %v2848_v7  ;;  %830 = vmatpush2.bf16.msra.mxu1 %v2849_v9 }
  0x73   :  { %831 = vmatprep.subr.bf16.mxu1 %v2850_v10 }
  0x75   :  { %903 = vmatpush2.bf16.msra.mxu0 %v2846_v8 }
  0x76   :  { %904 = vmatprep.subr.bf16.mxu0 %v2854_v11  ;;  %832 = vmatpush2.bf16.msra.mxu1 %v2855_v13 }
  0x77   :  { %833 = vmatprep.subr.bf16.mxu1 %v2856_v14 }
  0x79   :  { %905 = vmatpush2.bf16.msra.mxu0 %v2852_v12 }
  0x7a   :  { %906 = vmatprep.subr.bf16.mxu0 %v2860_v15  ;;  %834 = vmatpush2.bf16.msra.mxu1 %v2861_v17 }
  0x7d   :  { %907 = vmatpush2.bf16.msra.mxu0 %v2858_v16 }
 0x100   :  { %v3204_v18 = vpop.f32.mrf.mxu0 }
 0x101   :  { %v239_v31 = vmul.f32 %v3204_v18, %v3204_v18 }
 0x102   :  { %v3206_v19 = vpop.f32.mrf.mxu0 }
 0x103   :  { %v240_v36 = vmul.f32 %v3206_v19, %v3206_v19 }
 0x104   :  { %v3208_v20 = vpop.f32.mrf.mxu0 }
 0x105   :  { %v344_v21 = vpack.c.bf16 %v3208_v20, %v3204_v18  ;;  %v241_v28 = vmul.f32 %v3208_v20, %v3208_v20  ;;  %v210_v35 = vadd.f32 %v3208_v20, %v3204_v18 }
 0x106   :  { %v3212_v22 = vpop.f32.mrf.mxu0 }
 0x107   :  { %v345_v23 = vpack.c.bf16 %v3212_v22, %v3206_v19  ;;  %v242_v32 = vmul.f32 %v3212_v22, %v3212_v22  ;;  %v255_v37 = vadd.f32 %v241_v28, %v239_v31  ;;  %v223_v41 = vadd.f32 %v3212_v22, %v3206_v19 }
 0x108   :  { %v3216_v24 = vpop.f32.mrf.mxu0 }
 0x109   :  { %v243_v33 = vmul.f32 %v3216_v24, %v3216_v24  ;;  %v211_v42 = vadd.f32 %v210_v35, %v3216_v24  ;;  %v268_v43 = vadd.f32 %v242_v32, %v240_v36 }
 0x10a   :  { %v3218_v25 = vpop.f32.mrf.mxu0 }
 0x10b   :  { %v244_v38 = vmul.f32 %v3218_v25, %v3218_v25  ;;  %v256_v44 = vadd.f32 %v255_v37, %v243_v33  ;;  %v224_v48 = vadd.f32 %v223_v41, %v3218_v25 }
 0x10c   :  { %v3220_v26 = vpop.f32.mrf.mxu0 }
 0x10d   :  { %v346_v27 = vpack.c.bf16 %v3220_v26, %v3216_v24  ;;  %v245_v39 = vmul.f32 %v3220_v26, %v3220_v26  ;;  %v212_v49 = vadd.f32 %v211_v42, %v3220_v26  ;;  %v269_v51 = vadd.f32 %v268_v43, %v244_v38 }
 0x10e   :  { %v3226_v29 = vpop.f32.mrf.mxu0 }
 0x10f   :  { %v347_v30 = vpack.c.bf16 %v3226_v29, %v3218_v25  ;;  %v246_v45 = vmul.f32 %v3226_v29, %v3226_v29  ;;  %v257_v52 = vadd.f32 %v256_v44, %v245_v39  ;;  %v225_v56 = vadd.f32 %v224_v48, %v3226_v29 }
 0x110   :  { %v3236_v34 = vpop.f32.mrf.mxu0 }
 0x111   :  { %v247_v46 = vmul.f32 %v3236_v34, %v3236_v34  ;;  %v213_v57 = vadd.f32 %v212_v49, %v3236_v34  ;;  %v270_v59 = vadd.f32 %v269_v51, %v246_v45 }
 0x112   :  { %v3246_v40 = vpop.f32.mrf.mxu0 }
 0x113   :  { %v248_v53 = vmul.f32 %v3246_v40, %v3246_v40  ;;  %v258_v60 = vadd.f32 %v257_v52, %v247_v46  ;;  %v226_v63 = vadd.f32 %v225_v56, %v3246_v40 }
 0x114   :  { %v3255_v47 = vpop.f32.mrf.mxu0 }
 0x115   :  { %v348_v50 = vpack.c.bf16 %v3255_v47, %v3236_v34  ;;  %v249_v54 = vmul.f32 %v3255_v47, %v3255_v47  ;;  %v214_v1 = vadd.f32 %v213_v57, %v3255_v47  ;;  %v271_v3 = vadd.f32 %v270_v59, %v248_v53  ;;  %v2864_v47 = vld [vmem:[#allocation4 + $0x74] ss:$8 sps:$4 sm:$0xff]  }
 0x116   :  { %v3265_v55 = vpop.f32.mrf.mxu0  ;;  %1733 = vmatprep.subr.bf16.mxu1 %v2864_v47  ;;  %v2949_v47 = vld [vmem:[#allocation4 + $0x190] ss:$8 sps:$4 sm:$0xff]  }
 0x117   :  { %v349_v58 = vpack.c.bf16 %v3265_v55, %v3246_v40  ;;  %v250_v61 = vmul.f32 %v3265_v55, %v3265_v55  ;;  %v259_v4 = vadd.f32 %v258_v60, %v249_v54  ;;  %v227_v6 = vadd.f32 %v226_v63, %v3265_v55 }
 0x118   :  { %v3273_v62 = vpop.f32.mrf.mxu0 }
 0x119   :  { %v251_v2 = vmul.f32 %v3273_v62, %v3273_v62  ;;  %v215_v7 = vadd.f32 %v214_v1, %v3273_v62  ;;  %v272_v9 = vadd.f32 %v271_v3, %v250_v61 }
 0x11a   :  { %v3279_v5 = vpop.f32.mrf.mxu0 }
 0x11b   :  { %v252_v8 = vmul.f32 %v3279_v5, %v3279_v5  ;;  %v260_v10 = vadd.f32 %v259_v4, %v251_v2  ;;  %v228_v12 = vadd.f32 %v227_v6, %v3279_v5 }
 0x11c   :  { %v3285_v11 = vpop.f32.mrf.mxu0 }
 0x11d   :  { %v216_v13 = vadd.f32 %v215_v7, %v3285_v11  ;;  %v253_v14 = vmul.f32 %v3285_v11, %v3285_v11  ;;  %v350_v15 = vpack.c.bf16 %v3285_v11, %v3273_v62  ;;  %v273_v16 = vadd.f32 %v272_v9, %v252_v8  ;;  %v2871_v62 = vld [vmem:[#allocation4 + $0x160] ss:$8 sps:$4 sm:$0xff]   ;;  %v2876_v11 = vld [vmem:[#allocation4 + $0x54] ss:$8 sps:$4 sm:$0xff]  }
 0x11e   :  { %v3293_v17 = vpop.f32.mrf.mxu0 }
 0x11f   :  { %v217_v28 = vrot.slane %v216_v13, 4  ;;  %v261_v31 = vadd.f32 %v260_v10, %v253_v14  ;;  %v229_v32 = vadd.f32 %v228_v12, %v3293_v17  ;;  %v254_v33 = vmul.f32 %v3293_v17, %v3293_v17 }
 0x120   :  { %v351_v29 = vpack.c.bf16 %v3293_v17, %v3279_v5 }
 0x121   :  { %v218_v35 = vadd.f32 %v217_v28, %v216_v13  ;;  %v262_v36 = vrot.slane %v261_v31, 4  ;;  %v230_v37 = vrot.slane %v229_v32, 4  ;;  %v274_v38 = vadd.f32 %v273_v16, %v254_v33 }
 0x122   :  { %v3097_v28 = vmov 1966171168  }
 0x123   :  { %v219_v39 = vrot.slane %v218_v35, 2  ;;  %v263_v41 = vadd.f32 %v262_v36, %v261_v31  ;;  %v231_v42 = vadd.f32 %v230_v37, %v229_v32  ;;  %v275_v43 = vrot.slane %v274_v38, 4 }
 0x124   :  { %v297_v31 = vunpack.c.l.s4 %v3097_v28  ;;  %v299_v32 = vlaneseq }
 0x125   :  { %v220_v44 = vadd.f32 %v219_v39, %v218_v35  ;;  %v264_v45 = vrot.slane %v263_v41, 2  ;;  %v232_v46 = vrot.slane %v231_v42, 2  ;;  %v276_v48 = vadd.f32 %v275_v43, %v274_v38 }
 0x126   :  { %v298_v33 = vunpack.c.0.s8 %v297_v31  ;;  %v3298_v35 = vshrl.u32 %v299_v32, 7 }
 0x127   :  { %v221_v49 = vrot.slane %v220_v44, 1  ;;  %v265_v51 = vadd.f32 %v264_v45, %v263_v41  ;;  %v233_v52 = vadd.f32 %v232_v46, %v231_v42  ;;  %v277_v53 = vrot.slane %v276_v48, 2  ;;  %v208_v42 = vld [vmem:[%s3879_s6] sm:$0x3] }
 0x128   :  { %v3301_v37 = vsub.s32 %v298_v33, %v3298_v35  ;;  %v3312_v45 = vsub.s32 1, %v3298_v35 }
 0x129   :  { %v222_v54 = vadd.f32 %v221_v49, %v220_v44  ;;  %v266_v56 = vrot.slane %v265_v51, 1  ;;  %v234_v57 = vrot.slane %v233_v52, 1  ;;  %v278_v59 = vadd.f32 %v277_v53, %v276_v48 }
 0x12a   :  { %v3309_v44 = vsub.s32 0, %v3298_v35 }
 0x12b   :  { %v237_v60 = vmul.f32 0.015625, %v222_v54  ;;  %v267_v61 = vadd.f32 %v266_v56, %v265_v51  ;;  %v235_v63 = vadd.f32 %v234_v57, %v233_v52  ;;  %v279_v1 = vrot.slane %v278_v59, 1 }
 0x12d   :  { %v281_v2 = vmul.f32 0.015625, %v267_v61  ;;  %v283_v3 = vmul.f32 %v237_v60, %v237_v60  ;;  %v238_v4 = vmul.f32 0.015625, %v235_v63  ;;  %v280_v6 = vadd.f32 %v279_v1, %v278_v59  ;;  %v209_v59 = vld [vmem:[#allocation7] sm:$0x3] }
 0x12f   :  { %v285_v7 = vsub.f32 %v281_v2, %v283_v3  ;;  %v282_v8 = vmul.f32 0.015625, %v280_v6  ;;  %v284_v9 = vmul.f32 %v238_v4, %v238_v4 }
 0x131   :  { %v287_v10 = vmax.f32 %v285_v7, 0.0  ;;  %v286_v12 = vsub.f32 %v282_v8, %v284_v9 }
 0x133   :  { %v289_v13 = vadd.f32 1e-05, %v287_v10  ;;  %v288_v14 = vmax.f32 %v286_v12, 0.0 }
 0x135   :  { %v290_v16 = vadd.f32 1e-05, %v288_v14  ;;  %2982 = vrsqrt.f32 %v289_v13 }
 0x137   :  { %2984 = vrsqrt.f32 %v290_v16 }
 0x142   :  { %v2983_v36 = vpop.eup %2982 }
 0x144   :  { %v2985_v38 = vpop.eup %2984 }
 0x145   :  { %v295_v39 = vcombine.low %v2983_v36, %v2985_v38  ;;  %v2862_v38 = vld [vmem:[#allocation4 + $0x70] ss:$8 sps:$4 sm:$0xff]  }
 0x147   :  { %v302_v41 = vrot.slane %v295_v39, %v3301_v37  ;;  %v2865_v39 = vld [vmem:[#allocation4 + $0x170] ss:$8 sps:$4 sm:$0xff]  }
 0x149   :  { %v309_v43 = vrot.slane %v302_v41, %v3301_v37  ;;  %v2870_v41 = vld [vmem:[#allocation4 + $0x64] ss:$8 sps:$4 sm:$0xff]  }
 0x14b   :  { %v311_v46 = vmul.f32 %v309_v43, %v208_v42  ;;  %v2873_v42 = vld [vmem:[#allocation4 + $0x164] ss:$8 sps:$4 sm:$0xff]   ;;  %v2868_v43 = vld [vmem:[#allocation4 + $0x60] ss:$8 sps:$4 sm:$0xff]  }
 0x14d   :  { %v316_v48 = vrot.slane %v311_v46, %v3309_v44  ;;  %v320_v49 = vrot.slane %v311_v46, %v3312_v45  ;;  %v2874_v46 = vld [vmem:[#allocation4 + $0x50] ss:$8 sps:$4 sm:$0xff]  }
 0x14f   :  { %v323_v51 = vmul.f32 %v316_v48, %v237_v60  ;;  %v324_v52 = vmul.f32 %v320_v49, %v238_v4  ;;  %v353_v54 = vpack.c.bf16 %v320_v49, %v320_v49  ;;  %v352_v57 = vpack.c.bf16 %v316_v48, %v316_v48  ;;  %v2877_v48 = vld [vmem:[#allocation4 + $0x150] ss:$8 sps:$4 sm:$0xff]   ;;  %v2882_v49 = vld [vmem:[#allocation4 + $0x44] ss:$8 sps:$4 sm:$0xff]  }
 0x151   :  { %v327_v53 = vcombine.low %v323_v51, %v324_v52  ;;  %v362_v63 = vpack.i.b16 %v353_v54, %v353_v54  ;;  %v355_v2 = vpack.i.b16 %v352_v57, %v352_v57  ;;  %v2885_v51 = vld [vmem:[#allocation4 + $0x144] ss:$8 sps:$4 sm:$0xff]   ;;  %v2880_v52 = vld [vmem:[#allocation4 + $0x40] ss:$8 sps:$4 sm:$0xff]   ;;  %v2888_v54 = vld [vmem:[#allocation4 + $0x34] ss:$8 sps:$4 sm:$0xff]  }
 0x152   :  { %v2886_v57 = vld [vmem:[#allocation4 + $0x30] ss:$8 sps:$4 sm:$0xff]  }
 0x153   :  { %v334_v56 = vrot.slane %v327_v53, %v3301_v37  ;;  %v367_v7 = vrot.slane %v362_v63, %v3309_v44  ;;  %v360_v60 = vrot.slane %v355_v2, %v3309_v44  ;;  %v2883_v53 = vld [vmem:[#allocation4 + $0x140] ss:$8 sps:$4 sm:$0xff]   ;;  %v2897_v63 = vld [vmem:[#allocation4 + $0x124] ss:$8 sps:$4 sm:$0xff]  }
 0x154   :  { %v2895_v2 = vld [vmem:[#allocation4 + $0x120] ss:$8 sps:$4 sm:$0xff]  }
 0x155   :  { %v341_v61 = vrot.slane %v334_v56, %v3301_v37  ;;  %v369_v12 = vmul.bf16 %v367_v7, %v345_v23  ;;  %v368_v14 = vmul.bf16 %v360_v60, %v344_v21  ;;  %v371_v28 = vmul.bf16 %v367_v7, %v347_v30  ;;  %v2891_v56 = vld [vmem:[#allocation4 + $0x134] ss:$8 sps:$4 sm:$0xff]  }
 0x156   :  { %v370_v18 = vmul.bf16 %v360_v60, %v346_v27  ;;  %v373_v20 = vmul.bf16 %v367_v7, %v349_v58  ;;  %v372_v24 = vmul.bf16 %v360_v60, %v348_v50  ;;  %v375_v26 = vmul.bf16 %v367_v7, %v351_v29  ;;  %v2867_v50 = vld [vmem:[#allocation4 + $0x174] ss:$8 sps:$4 sm:$0xff]   ;;  %v2898_v7 = vld [vmem:[#allocation4 + $0x10] ss:$8 sps:$4 sm:$0xff]  }
 0x157   :  { %v343_v1 = vsub.f32 %v209_v59, %v341_v61  ;;  %v374_v5 = vmul.bf16 %v360_v60, %v350_v15  ;;  %1806 = vmatprep.subr.bf16.mxu0 %v2867_v50  ;;  %v2879_v15 = vld [vmem:[#allocation4 + $0x154] ss:$8 sps:$4 sm:$0xff]   ;;  %v2889_v59 = vld [vmem:[#allocation4 + $0x130] ss:$8 sps:$4 sm:$0xff]   ;;  %v2894_v61 = vld [vmem:[#allocation4 + $0x24] ss:$8 sps:$4 sm:$0xff]  }
 0x158   :  { %v2906_v60 = vld [vmem:[#allocation4 + $0x4] ss:$8 sps:$4 sm:$0xff]   ;;  %v2936_v29 = vld [vmem:[#allocation4 + $0xb4] ss:$8 sps:$4 sm:$0xff]  }
 0x159   :  { %v384_v3 = vrot.slane %v343_v1, %v3312_v45  ;;  %v380_v6 = vrot.slane %v343_v1, %v3309_v44  ;;  %v2892_v1 = vld [vmem:[#allocation4 + $0x20] ss:$8 sps:$4 sm:$0xff]   ;;  %v2954_v50 = vld [vmem:[#allocation4 + $0x84] ss:$8 sps:$4 sm:$0xff]  }
 0x15b   :  { %v388_v8 = vpack.c.bf16 %v384_v3, %v384_v3  ;;  %v387_v4 = vpack.c.bf16 %v380_v6, %v380_v6  ;;  %v2900_v3 = vld [vmem:[#allocation4 + $0x14] ss:$8 sps:$4 sm:$0xff]  }
 0x15c   :  { %v2903_v6 = vld [vmem:[#allocation4 + $0x114] ss:$8 sps:$4 sm:$0xff]  }
 0x15d   :  { %v397_v9 = vpack.i.b16 %v388_v8, %v388_v8  ;;  %v390_v10 = vpack.i.b16 %v387_v4, %v387_v4  ;;  %v2901_v8 = vld [vmem:[#allocation4 + $0x110] ss:$8 sps:$4 sm:$0xff]   ;;  %v2909_v4 = vld [vmem:[#allocation4 + $0x104] ss:$8 sps:$4 sm:$0xff]  }
 0x15f   :  { %v402_v13 = vrot.slane %v397_v9, %v3309_v44  ;;  %v395_v16 = vrot.slane %v390_v10, %v3309_v44  ;;  %v2904_v9 = vld [vmem:[#allocation4] ss:$8 sps:$4 sm:$0xff]  }
 0x160   :  { %v2907_v10 = vld [vmem:[#allocation4 + $0x100] ss:$8 sps:$4 sm:$0xff]  }
 0x161   :  { %v404_v31 = vadd.bf16 %v402_v13, %v369_v12  ;;  %v403_v32 = vadd.bf16 %v395_v16, %v368_v14  ;;  %v406_v33 = vadd.bf16 %v402_v13, %v371_v28  ;;  %v405_v21 = vadd.bf16 %v395_v16, %v370_v18  ;;  %v2912_v12 = vld [vmem:[#allocation4 + $0xf4] ss:$8 sps:$4 sm:$0xff]   ;;  %v2910_v14 = vld [vmem:[#allocation4 + $0xf0] ss:$8 sps:$4 sm:$0xff]   ;;  %v2918_v28 = vld [vmem:[#allocation4 + $0xe4] ss:$8 sps:$4 sm:$0xff]  }
 0x162   :  { %v408_v23 = vadd.bf16 %v402_v13, %v373_v20  ;;  %v407_v27 = vadd.bf16 %v395_v16, %v372_v24  ;;  %v410_v40 = vadd.bf16 %v402_v13, %v375_v26  ;;  %v409_v17 = vadd.bf16 %v395_v16, %v374_v5  ;;  %v2915_v13 = vld [vmem:[#allocation4 + $0x1f4] ss:$8 sps:$4 sm:$0xff]   ;;  %v2913_v16 = vld [vmem:[#allocation4 + $0x1f0] ss:$8 sps:$4 sm:$0xff]   ;;  %v2928_v20 = vld [vmem:[#allocation4 + $0xc0] ss:$8 sps:$4 sm:$0xff]  }
 0x163   :  { %v412_v36 = vmax.bf16 %v3883_v0, %v404_v31  ;;  %v411_v19 = vmax.bf16 %v3883_v0, %v403_v32  ;;  %v414_v22 = vmax.bf16 %v3883_v0, %v406_v33  ;;  %v413_v25 = vmax.bf16 %v3883_v0, %v405_v21  ;;  %v2921_v31 = vld [vmem:[#allocation4 + $0x1e4] ss:$8 sps:$4 sm:$0xff]   ;;  %v2916_v32 = vld [vmem:[#allocation4 + $0xe0] ss:$8 sps:$4 sm:$0xff]   ;;  %v2925_v18 = vld [vmem:[#allocation4 + $0x1d0] ss:$8 sps:$4 sm:$0xff]  }
 0x164   :  { %v416_v30 = vmax.bf16 %v3883_v0, %v408_v23  ;;  %v415_v55 = vmax.bf16 %v3883_v0, %v407_v27  ;;  %v418_v58 = vmax.bf16 %v3883_v0, %v410_v40  ;;  %v417_v34 = vmax.bf16 %v3883_v0, %v409_v17  ;;  %v2919_v33 = vld [vmem:[#allocation4 + $0x1e0] ss:$8 sps:$4 sm:$0xff]   ;;  %v2930_v21 = vld [vmem:[#allocation4 + $0xc4] ss:$8 sps:$4 sm:$0xff]   ;;  %v2934_v24 = vld [vmem:[#allocation4 + $0xb0] ss:$8 sps:$4 sm:$0xff]  }
 0x165   :  { %835 = vmatprep.mubr.bf16.mxu1 %v412_v36  ;;  %908 = vmatprep.mubr.bf16.mxu0 %v412_v36  ;;  %v2924_v36 = vld [vmem:[#allocation4 + $0xd4] ss:$8 sps:$4 sm:$0xff]   ;;  %v2931_v23 = vld [vmem:[#allocation4 + $0x1c0] ss:$8 sps:$4 sm:$0xff]   ;;  %v2937_v26 = vld [vmem:[#allocation4 + $0x1b0] ss:$8 sps:$4 sm:$0xff]  }
 0x166   :  { %836 = vmatmul.mubr.bf16.vlgmr.msra.gmra.mxu1 %v411_v19  ;;  %909 = vmatmul.mubr.bf16.vlgmr.msra.gmra.mxu0 %v411_v19  ;;  %v2927_v19 = vld [vmem:[#allocation4 + $0x1d4] ss:$8 sps:$4 sm:$0xff]   ;;  %v2942_v27 = vld [vmem:[#allocation4 + $0xa4] ss:$8 sps:$4 sm:$0xff]  }
 0x167   :  { %845 = vmatprep.mubr.bf16.mxu1 %v414_v22  ;;  %918 = vmatprep.mubr.bf16.mxu0 %v414_v22  ;;  %v2922_v22 = vld [vmem:[#allocation4 + $0xd0] ss:$8 sps:$4 sm:$0xff]   ;;  %v2945_v40 = vld [vmem:[#allocation4 + $0x1a4] ss:$8 sps:$4 sm:$0xff]   ;;  %v2948_v5 = vld [vmem:[#allocation4 + $0x94] ss:$8 sps:$4 sm:$0xff]  }
 0x168   :  { %1734 = vmatpush1.bf16.msra.mxu1 %v2862_v38  ;;  %1807 = vmatpush1.bf16.msra.mxu0 %v2865_v39  ;;  %v2951_v17 = vld [vmem:[#allocation4 + $0x194] ss:$8 sps:$4 sm:$0xff]   ;;  %v2957_v38 = vld [vmem:[#allocation4 + $0x184] ss:$8 sps:$4 sm:$0xff]   ;;  %v2952_v39 = vld [vmem:[#allocation4 + $0x80] ss:$8 sps:$4 sm:$0xff]  }
 0x169   :  { %1735 = vmatprep.subr.bf16.mxu1 %v2870_v41  ;;  %1808 = vmatprep.subr.bf16.mxu0 %v2873_v42  ;;  %v2955_v41 = vld [vmem:[#allocation4 + $0x180] ss:$8 sps:$4 sm:$0xff]  }
 0x16c   :  { %1736 = vmatpush1.bf16.msra.mxu1 %v2868_v43  ;;  %1809 = vmatpush1.bf16.msra.mxu0 %v2871_v62 }
 0x16d   :  { %1737 = vmatprep.subr.bf16.mxu1 %v2876_v11  ;;  %1810 = vmatprep.subr.bf16.mxu0 %v2879_v15 }
 0x16e   :  { %846 = vmatmul.mubr.bf16.gmra.mxu1 %v413_v25  ;;  %919 = vmatmul.mubr.bf16.gmra.mxu0 %v413_v25  ;;  %v2933_v25 = vld [vmem:[#allocation4 + $0x1c4] ss:$8 sps:$4 sm:$0xff]  }
 0x16f   :  { %855 = vmatprep.mubr.bf16.mxu1 %v416_v30  ;;  %928 = vmatprep.mubr.bf16.mxu0 %v416_v30  ;;  %v2939_v30 = vld [vmem:[#allocation4 + $0x1b4] ss:$8 sps:$4 sm:$0xff]  }
 0x170   :  { %1738 = vmatpush1.bf16.msra.mxu1 %v2874_v46  ;;  %1811 = vmatpush1.bf16.msra.mxu0 %v2877_v48 }
 0x171   :  { %1739 = vmatprep.subr.bf16.mxu1 %v2882_v49  ;;  %1812 = vmatprep.subr.bf16.mxu0 %v2885_v51 }
 0x174   :  { %1740 = vmatpush1.bf16.msra.mxu1 %v2880_v52  ;;  %1813 = vmatpush1.bf16.msra.mxu0 %v2883_v53 }
 0x175   :  { %1741 = vmatprep.subr.bf16.mxu1 %v2888_v54  ;;  %1814 = vmatprep.subr.bf16.mxu0 %v2891_v56 }
 0x176   :  { %856 = vmatmul.mubr.bf16.gmra.mxu1 %v415_v55  ;;  %929 = vmatmul.mubr.bf16.gmra.mxu0 %v415_v55  ;;  %v2940_v55 = vld [vmem:[#allocation4 + $0xa0] ss:$8 sps:$4 sm:$0xff]  }
 0x177   :  { %865 = vmatprep.mubr.bf16.mxu1 %v418_v58  ;;  %938 = vmatprep.mubr.bf16.mxu0 %v418_v58  ;;  %v2943_v58 = vld [vmem:[#allocation4 + $0x1a0] ss:$8 sps:$4 sm:$0xff]  }
 0x178   :  { %1742 = vmatpush1.bf16.msra.mxu1 %v2886_v57  ;;  %1815 = vmatpush1.bf16.msra.mxu0 %v2889_v59 }
 0x179   :  { %1743 = vmatprep.subr.bf16.mxu1 %v2894_v61  ;;  %1816 = vmatprep.subr.bf16.mxu0 %v2897_v63 }
 0x17c   :  { %1744 = vmatpush1.bf16.msra.mxu1 %v2892_v1  ;;  %1817 = vmatpush1.bf16.msra.mxu0 %v2895_v2 }
 0x17d   :  { %1745 = vmatprep.subr.bf16.mxu1 %v2900_v3  ;;  %1818 = vmatprep.subr.bf16.mxu0 %v2903_v6 }
 0x17e   :  { %866 = vmatmul.mubr.bf16.gmra.mxu1 %v417_v34  ;;  %939 = vmatmul.mubr.bf16.gmra.mxu0 %v417_v34  ;;  %v2946_v34 = vld [vmem:[#allocation4 + $0x90] ss:$8 sps:$4 sm:$0xff]  }
 0x180   :  { %1746 = vmatpush1.bf16.msra.mxu1 %v2898_v7  ;;  %1819 = vmatpush1.bf16.msra.mxu0 %v2901_v8 }
 0x181   :  { %1747 = vmatprep.subr.bf16.mxu1 %v2906_v60  ;;  %1820 = vmatprep.subr.bf16.mxu0 %v2909_v4 }
 0x184   :  { %1748 = vmatpush1.bf16.msra.mxu1 %v2904_v9  ;;  %1821 = vmatpush1.bf16.msra.mxu0 %v2907_v10 }
 0x185   :  { %1749 = vmatprep.subr.bf16.mxu1 %v2912_v12  ;;  %1822 = vmatprep.subr.bf16.mxu0 %v2915_v13 }
 0x188   :  { %1750 = vmatpush2.bf16.msra.mxu1 %v2910_v14  ;;  %1823 = vmatpush2.bf16.msra.mxu0 %v2913_v16 }
 0x189   :  { %1751 = vmatprep.subr.bf16.mxu1 %v2918_v28  ;;  %1824 = vmatprep.subr.bf16.mxu0 %v2921_v31 }
 0x18c   :  { %1752 = vmatpush2.bf16.msra.mxu1 %v2916_v32  ;;  %1825 = vmatpush2.bf16.msra.mxu0 %v2919_v33 }
 0x18d   :  { %1753 = vmatprep.subr.bf16.mxu1 %v2924_v36  ;;  %1826 = vmatprep.subr.bf16.mxu0 %v2927_v19 }
 0x190   :  { %1754 = vmatpush2.bf16.msra.mxu1 %v2922_v22  ;;  %1827 = vmatpush2.bf16.msra.mxu0 %v2925_v18 }
 0x191   :  { %1755 = vmatprep.subr.bf16.mxu1 %v2930_v21  ;;  %1828 = vmatprep.subr.bf16.mxu0 %v2933_v25 }
 0x194   :  { %1756 = vmatpush2.bf16.msra.mxu1 %v2928_v20  ;;  %1829 = vmatpush2.bf16.msra.mxu0 %v2931_v23 }
 0x195   :  { %1757 = vmatprep.subr.bf16.mxu1 %v2936_v29  ;;  %1830 = vmatprep.subr.bf16.mxu0 %v2939_v30 }
 0x198   :  { %1758 = vmatpush2.bf16.msra.mxu1 %v2934_v24  ;;  %1831 = vmatpush2.bf16.msra.mxu0 %v2937_v26 }
 0x199   :  { %1759 = vmatprep.subr.bf16.mxu1 %v2942_v27  ;;  %1832 = vmatprep.subr.bf16.mxu0 %v2945_v40 }
 0x19c   :  { %1760 = vmatpush2.bf16.msra.mxu1 %v2940_v55  ;;  %1833 = vmatpush2.bf16.msra.mxu0 %v2943_v58 }
 0x19d   :  { %1761 = vmatprep.subr.bf16.mxu1 %v2948_v5  ;;  %1834 = vmatprep.subr.bf16.mxu0 %v2951_v17 }
 0x1a0   :  { %1762 = vmatpush2.bf16.msra.mxu1 %v2946_v34  ;;  %1835 = vmatpush2.bf16.msra.mxu0 %v2949_v47 }
 0x1a1   :  { %1763 = vmatprep.subr.bf16.mxu1 %v2954_v50  ;;  %1836 = vmatprep.subr.bf16.mxu0 %v2957_v38 }
 0x1a4   :  { %1764 = vmatpush2.bf16.msra.mxu1 %v2952_v39  ;;  %1837 = vmatpush2.bf16.msra.mxu0 %v2955_v41 }
 0x226   :  { %v3355_v42 = vpop.f32.mrf.mxu1  ;;  %v3357_v43 = vpop.f32.mrf.mxu0 }
 0x227   :  { %v1007_v1 = vmul.f32 %v3355_v42, %v3355_v42  ;;  %v1009_v2 = vmul.f32 %v3357_v43, %v3357_v43 }
 0x228   :  { %v3359_v62 = vpop.f32.mrf.mxu1  ;;  %v3361_v11 = vpop.f32.mrf.mxu0 }
 0x229   :  { %v1008_v3 = vmul.f32 %v3359_v62, %v3359_v62  ;;  %v1010_v6 = vmul.f32 %v3361_v11, %v3361_v11 }
 0x22a   :  { %v3363_v15 = vpop.f32.mrf.mxu1  ;;  %v3365_v46 = vpop.f32.mrf.mxu0 }
 0x22b   :  { %v1011_v53 = vmul.f32 %v3363_v15, %v3363_v15  ;;  %v1013_v56 = vmul.f32 %v3365_v46, %v3365_v46  ;;  %v951_v7 = vadd.f32 %v3363_v15, %v3355_v42  ;;  %v977_v10 = vadd.f32 %v3365_v46, %v3357_v43 }
 0x22c   :  { %v3371_v51 = vpop.f32.mrf.mxu1  ;;  %v3373_v52 = vpop.f32.mrf.mxu0 }
 0x22d   :  { %v1012_v57 = vmul.f32 %v3371_v51, %v3371_v51  ;;  %v1014_v8 = vmul.f32 %v3373_v52, %v3373_v52  ;;  %v1039_v9 = vadd.f32 %v1011_v53, %v1007_v1  ;;  %v964_v12 = vadd.f32 %v3371_v51, %v3359_v62 }
 0x22e   :  { %v3385_v61 = vpop.f32.mrf.mxu1  ;;  %v3387_v63 = vpop.f32.mrf.mxu0  ;;  %v1065_v14 = vadd.f32 %v1013_v56, %v1009_v2  ;;  %v990_v28 = vadd.f32 %v3373_v52, %v3361_v11 }
 0x22f   :  { %v1015_v13 = vmul.f32 %v3385_v61, %v3385_v61  ;;  %v1052_v16 = vadd.f32 %v1012_v57, %v1008_v3  ;;  %v1017_v31 = vmul.f32 %v3387_v63, %v3387_v63  ;;  %v952_v36 = vadd.f32 %v951_v7, %v3385_v61 }
 0x230   :  { %v3401_v60 = vpop.f32.mrf.mxu1  ;;  %v3403_v4 = vpop.f32.mrf.mxu0  ;;  %v978_v19 = vadd.f32 %v977_v10, %v3387_v63  ;;  %v1078_v20 = vadd.f32 %v1014_v8, %v1010_v6 }
 0x231   :  { %v1016_v22 = vmul.f32 %v3401_v60, %v3401_v60  ;;  %v1018_v21 = vmul.f32 %v3403_v4, %v3403_v4  ;;  %v1040_v24 = vadd.f32 %v1039_v9, %v1015_v13  ;;  %v965_v26 = vadd.f32 %v964_v12, %v3401_v60 }
 0x232   :  { %v3415_v32 = vpop.f32.mrf.mxu1  ;;  %v3417_v33 = vpop.f32.mrf.mxu0  ;;  %v1066_v55 = vadd.f32 %v1065_v14, %v1017_v31  ;;  %v991_v58 = vadd.f32 %v990_v28, %v3403_v4 }
 0x233   :  { %v1019_v23 = vmul.f32 %v3415_v32, %v3415_v32  ;;  %v1021_v27 = vmul.f32 %v3417_v33, %v3417_v33  ;;  %v1053_v50 = vadd.f32 %v1052_v16, %v1016_v22  ;;  %v953_v38 = vadd.f32 %v952_v36, %v3415_v32 }
 0x234   :  { %v3431_v29 = vpop.f32.mrf.mxu1  ;;  %v3433_v30 = vpop.f32.mrf.mxu0  ;;  %v1079_v53 = vadd.f32 %v1078_v20, %v1018_v21  ;;  %v979_v57 = vadd.f32 %v978_v19, %v3417_v33 }
 0x235   :  { %v1020_v5 = vmul.f32 %v3431_v29, %v3431_v29  ;;  %v1022_v39 = vmul.f32 %v3433_v30, %v3433_v30  ;;  %v1041_v56 = vadd.f32 %v1040_v24, %v1019_v23  ;;  %v966_v1 = vadd.f32 %v965_v26, %v3431_v29 }
 0x236   :  { %v3445_v34 = vpop.f32.mrf.mxu1  ;;  %v3447_v47 = vpop.f32.mrf.mxu0  ;;  %v1067_v6 = vadd.f32 %v1066_v55, %v1021_v27  ;;  %v992_v7 = vadd.f32 %v991_v58, %v3433_v30 }
 0x237   :  { %3891 = vst [vmem:[#allocation12_spill] sm:$0xff] %v3447_v47  ;;  %v1023_v41 = vmul.f32 %v3445_v34, %v3445_v34  ;;  %v1025_v8 = vmul.f32 %v3447_v47, %v3447_v47  ;;  %v1054_v10 = vadd.f32 %v1053_v50, %v1020_v5  ;;  %v954_v12 = vadd.f32 %v953_v38, %v3445_v34 }
 0x238   :  { %v3456_v2 = vpop.f32.mrf.mxu1  ;;  %v3458_v3 = vpop.f32.mrf.mxu0  ;;  %v980_v13 = vadd.f32 %v979_v57, %v3447_v47  ;;  %v1080_v31 = vadd.f32 %v1079_v53, %v1022_v39 }
 0x239   :  { %v1024_v9 = vmul.f32 %v3456_v2, %v3456_v2  ;;  %v1026_v14 = vmul.f32 %v3458_v3, %v3458_v3  ;;  %v1042_v36 = vadd.f32 %v1041_v56, %v1023_v41  ;;  %v967_v20 = vadd.f32 %v966_v1, %v3456_v2 }
 0x23a   :  { %v3469_v16 = vpop.f32.mrf.mxu1  ;;  %v3471_v28 = vpop.f32.mrf.mxu0  ;;  %v993_v21 = vadd.f32 %v992_v7, %v3458_v3  ;;  %v1068_v55 = vadd.f32 %v1067_v6, %v1025_v8 }
 0x23b   :  { %3892 = vst [vmem:[#allocation13_spill] sm:$0xff] %v3471_v28  ;;  %v1027_v19 = vmul.f32 %v3469_v16, %v3469_v16  ;;  %v1029_v23 = vmul.f32 %v3471_v28, %v3471_v28  ;;  %v1055_v58 = vadd.f32 %v1054_v10, %v1024_v9  ;;  %v1081_v38 = vadd.f32 %v1080_v31, %v1026_v14 }
 0x23c   :  { %v3483_v26 = vpop.f32.mrf.mxu1  ;;  %v3485_v27 = vpop.f32.mrf.mxu0  ;;  %v955_v39 = vadd.f32 %v954_v12, %v3469_v16  ;;  %v981_v6 = vadd.f32 %v980_v13, %v3471_v28 }
 0x23d   :  { %v1028_v5 = vmul.f32 %v3483_v26, %v3483_v26  ;;  %v1030_v41 = vmul.f32 %v3485_v27, %v3485_v27  ;;  %v1043_v1 = vadd.f32 %v1042_v36, %v1027_v19  ;;  %v968_v7 = vadd.f32 %v967_v20, %v3483_v26 }
 0x23e   :  { %v3496_v56 = vpop.f32.mrf.mxu1  ;;  %v3498_v57 = vpop.f32.mrf.mxu0  ;;  %v1069_v9 = vadd.f32 %v1068_v55, %v1029_v23  ;;  %v994_v12 = vadd.f32 %v993_v21, %v3485_v27 }
 0x23f   :  { %3893 = vst [vmem:[#allocation14_spill] sm:$0xff] %v3496_v56  ;;  %3894 = vst [vmem:[#allocation15_spill] sm:$0xff] %v3498_v57  ;;  %v1031_v8 = vmul.f32 %v3496_v56, %v3496_v56  ;;  %v1056_v10 = vadd.f32 %v1055_v58, %v1028_v5  ;;  %v1033_v14 = vmul.f32 %v3498_v57, %v3498_v57 }
 0x240   :  { %v3507_v31 = vpop.f32.mrf.mxu1  ;;  %v3509_v24 = vpop.f32.mrf.mxu0  ;;  %v1082_v22 = vadd.f32 %v1081_v38, %v1030_v41  ;;  %v956_v36 = vadd.f32 %v955_v39, %v3496_v56  ;;  %v982_v13 = vadd.f32 %v981_v6, %v3498_v57 }
 0x241   :  { %v1032_v19 = vmul.f32 %v3507_v31, %v3507_v31  ;;  %v1044_v20 = vadd.f32 %v1043_v1, %v1031_v8  ;;  %v969_v23 = vadd.f32 %v968_v7, %v3507_v31  ;;  %v995_v21 = vadd.f32 %v994_v12, %v3509_v24 }
 0x242   :  { %v1034_v55 = vmul.f32 %v3509_v24, %v3509_v24  ;;  %v3519_v58 = vpop.f32.mrf.mxu1  ;;  %v3521_v5 = vpop.f32.mrf.mxu0  ;;  %v1070_v38 = vadd.f32 %v1069_v9, %v1033_v14 }
 0x243   :  { %3895 = vst [vmem:[#allocation16_spill] sm:$0xff] %v3519_v58  ;;  %3896 = vst [vmem:[#allocation17_spill] sm:$0xff] %v3521_v5  ;;  %v957_v39 = vadd.f32 %v956_v36, %v3519_v58  ;;  %v1035_v41 = vmul.f32 %v3519_v58, %v3519_v58  ;;  %v1057_v6 = vadd.f32 %v1056_v10, %v1032_v19 }
 0x244   :  { %v983_v7 = vadd.f32 %v982_v13, %v3521_v5  ;;  %v1037_v8 = vmul.f32 %v3521_v5, %v3521_v5  ;;  %v3533_v53 = vpop.f32.mrf.mxu1  ;;  %v3535_v9 = vpop.f32.mrf.mxu0  ;;  %v1083_v10 = vadd.f32 %v1082_v22, %v1034_v55 }
 0x245   :  { %v958_v14 = vrot.slane %v957_v39, 4  ;;  %v1045_v36 = vadd.f32 %v1044_v20, %v1035_v41  ;;  %v970_v50 = vadd.f32 %v969_v23, %v3533_v53  ;;  %v1036_v1 = vmul.f32 %v3533_v53, %v3533_v53 }
 0x246   :  { %v984_v19 = vrot.slane %v983_v7, 4  ;;  %v1071_v13 = vadd.f32 %v1070_v38, %v1037_v8  ;;  %v996_v25 = vadd.f32 %v995_v21, %v3535_v9  ;;  %v1038_v20 = vmul.f32 %v3535_v9, %v3535_v9 }
 0x247   :  { %v959_v18 = vadd.f32 %v958_v14, %v957_v39  ;;  %v1046_v0 = vrot.slane %v1045_v36, 4  ;;  %v971_v17 = vrot.slane %v970_v50, 4  ;;  %v1058_v12 = vadd.f32 %v1057_v6, %v1036_v1 }
 0x248   :  { %v985_v40 = vadd.f32 %v984_v19, %v983_v7  ;;  %v1072_v49 = vrot.slane %v1071_v13, 4  ;;  %v997_v48 = vrot.slane %v996_v25, 4  ;;  %v1084_v38 = vadd.f32 %v1083_v10, %v1038_v20 }
 0x249   :  { %v960_v41 = vrot.slane %v959_v18, 2  ;;  %v1047_v23 = vadd.f32 %v1046_v0, %v1045_v36  ;;  %v972_v59 = vadd.f32 %v971_v17, %v970_v50  ;;  %v1059_v54 = vrot.slane %v1058_v12, 4 }
 0x24a   :  { %v986_v57 = vrot.slane %v985_v40, 2  ;;  %v1073_v22 = vadd.f32 %v1072_v49, %v1071_v13  ;;  %v998_v55 = vadd.f32 %v997_v48, %v996_v25  ;;  %v1085_v7 = vrot.slane %v1084_v38, 4 }
 0x24b   :  { %v961_v8 = vadd.f32 %v960_v41, %v959_v18  ;;  %v1048_v21 = vrot.slane %v1047_v23, 2  ;;  %v973_v39 = vrot.slane %v972_v59, 2  ;;  %v1060_v14 = vadd.f32 %v1059_v54, %v1058_v12 }
 0x24c   :  { %v987_v5 = vadd.f32 %v986_v57, %v985_v40  ;;  %v1074_v1 = vrot.slane %v1073_v22, 2  ;;  %v999_v6 = vrot.slane %v998_v55, 2  ;;  %v1086_v50 = vadd.f32 %v1085_v7, %v1084_v38 }
 0x24d   :  { %v962_v19 = vrot.slane %v961_v8, 1  ;;  %v1049_v56 = vadd.f32 %v1048_v21, %v1047_v23  ;;  %v974_v58 = vadd.f32 %v973_v39, %v972_v59  ;;  %v1061_v47 = vrot.slane %v1060_v14, 2 }
 0x24e   :  { %v988_v28 = vrot.slane %v987_v5, 1  ;;  %v1075_v0 = vadd.f32 %v1074_v1, %v1073_v22  ;;  %v1000_v17 = vadd.f32 %v999_v6, %v998_v55  ;;  %v1087_v54 = vrot.slane %v1086_v50, 2 }
 0x24f   :  { %v963_v36 = vadd.f32 %v962_v19, %v961_v8  ;;  %v1050_v49 = vrot.slane %v1049_v56, 1  ;;  %v975_v48 = vrot.slane %v974_v58, 1  ;;  %v1062_v25 = vadd.f32 %v1061_v47, %v1060_v14 }
 0x250   :  { %v989_v18 = vadd.f32 %v988_v28, %v987_v5  ;;  %v1076_v10 = vrot.slane %v1075_v0, 1  ;;  %v1001_v13 = vrot.slane %v1000_v17, 1  ;;  %v1088_v21 = vadd.f32 %v1087_v54, %v1086_v50 }
 0x251   :  { %v1003_v40 = vmul.f32 0.015625, %v963_v36  ;;  %v1051_v57 = vadd.f32 %v1050_v49, %v1049_v56  ;;  %v976_v12 = vadd.f32 %v975_v48, %v974_v58  ;;  %v1063_v20 = vrot.slane %v1062_v25, 1 }
 0x252   :  { %v1005_v41 = vmul.f32 0.015625, %v989_v18  ;;  %v1077_v23 = vadd.f32 %v1076_v10, %v1075_v0  ;;  %v1002_v59 = vadd.f32 %v1001_v13, %v1000_v17  ;;  %v1089_v47 = vrot.slane %v1088_v21, 1 }
 0x253   :  { %v1091_v39 = vmul.f32 0.015625, %v1051_v57  ;;  %v1095_v22 = vmul.f32 %v1003_v40, %v1003_v40  ;;  %v1004_v55 = vmul.f32 0.015625, %v976_v12  ;;  %v1064_v38 = vadd.f32 %v1063_v20, %v1062_v25 }
 0x254   :  { %v1093_v8 = vmul.f32 0.015625, %v1077_v23  ;;  %v1097_v1 = vmul.f32 %v1005_v41, %v1005_v41  ;;  %v1006_v6 = vmul.f32 0.015625, %v1002_v59  ;;  %v1090_v19 = vadd.f32 %v1089_v47, %v1088_v21 }
 0x255   :  { %v1099_v28 = vsub.f32 %v1091_v39, %v1095_v22  ;;  %v1092_v5 = vmul.f32 0.015625, %v1064_v38  ;;  %v1096_v14 = vmul.f32 %v1004_v55, %v1004_v55  ;;  %v949_v38 = vld [vmem:[%s3879_s6 + $0x2] sm:$0xf]  ;;  %v1160_v47 = vsub.s32 3, %v3298_v35 }
 0x256   :  { %v1101_v7 = vsub.f32 %v1093_v8, %v1097_v1  ;;  %v1098_v56 = vmul.f32 %v1006_v6, %v1006_v6  ;;  %v1094_v0 = vmul.f32 0.015625, %v1090_v19  ;;  %v1156_v1 = vsub.s32 2, %v3298_v35 }
 0x257   :  { %v1103_v58 = vmax.f32 %v1099_v28, 0.0  ;;  %v1100_v36 = vsub.f32 %v1092_v5, %v1096_v14 }
 0x258   :  { %v1105_v49 = vmax.f32 %v1101_v7, 0.0  ;;  %v1102_v48 = vsub.f32 %v1094_v0, %v1098_v56 }
 0x259   :  { %v1107_v17 = vadd.f32 1e-05, %v1103_v58  ;;  %v1104_v50 = vmax.f32 %v1100_v36, 0.0 }
 0x25a   :  { %v1109_v18 = vadd.f32 1e-05, %v1105_v49  ;;  %v1106_v25 = vmax.f32 %v1102_v48, 0.0 }
 0x25b   :  { %v1108_v10 = vadd.f32 1e-05, %v1104_v50  ;;  %2986 = vrsqrt.f32 %v1107_v17 }
 0x25c   :  { %v1110_v13 = vadd.f32 1e-05, %v1106_v25 }
 0x25d   :  { %2988 = vrsqrt.f32 %v1108_v10 }
 0x25e   :  { %2990 = vrsqrt.f32 %v1109_v18 }
 0x25f   :  { %2992 = vrsqrt.f32 %v1110_v13 }
 0x268   :  { %v2987_v54 = vpop.eup %2986 }
 0x26a   :  { %v2989_v57 = vpop.eup %2988 }
 0x26b   :  { %v1119_v12 = vcombine.low %v2987_v54, %v2989_v57  ;;  %v2991_v20 = vpop.eup %2990  ;;  %v950_v54 = vld [vmem:[#allocation7 + $0x2] sm:$0xf] }
 0x26c   :  { %v2993_v23 = vpop.eup %2992 }
 0x26d   :  { %v1120_v59 = vcombine.low %v2991_v20, %v2993_v23  ;;  %v1127_v21 = vrot.slane %v1119_v12, %v3301_v37 }
 0x26f   :  { %v1134_v39 = vrot.slane %v1120_v59, %v3301_v37 }
 0x271   :  { %v1135_v22 = vcombine.low %v1127_v21, %v1134_v39 }
 0x273   :  { %v1142_v8 = vrot.slane %v1135_v22, %v3301_v37 }
 0x275   :  { %v1144_v28 = vmul.f32 %v1142_v8, %v949_v38 }
 0x277   :  { %v1149_v5 = vrot.slane %v1144_v28, %v3309_v44  ;;  %v1153_v14 = vrot.slane %v1144_v28, %v3312_v45  ;;  %v1157_v7 = vrot.slane %v1144_v28, %v1156_v1  ;;  %v1161_v19 = vrot.slane %v1144_v28, %v1160_v47 }
 0x279   :  { %v1166_v56 = vmul.f32 %v1149_v5, %v1003_v40  ;;  %v1167_v58 = vmul.f32 %v1153_v14, %v1004_v55  ;;  %v1168_v36 = vmul.f32 %v1157_v7, %v1005_v41  ;;  %v1169_v49 = vmul.f32 %v1161_v19, %v1006_v6 }
 0x27a   :  { %v1218_v18 = vpack.c.bf16 %v1157_v7, %v1157_v7  ;;  %v1219_v10 = vpack.c.bf16 %v1161_v19, %v1161_v19  ;;  %v1217_v35 = vpack.c.bf16 %v1153_v14, %v1153_v14  ;;  %v1216_v25 = vpack.c.bf16 %v1149_v5, %v1149_v5 }
 0x27b   :  { %v1174_v0 = vcombine.low %v1166_v56, %v1167_v58  ;;  %v1175_v17 = vcombine.low %v1168_v36, %v1169_v49  ;;  %v3897_v58 = vpack.c.bf16 %v3371_v51, %v3359_v62  ;;  %v3898_v49 = vpack.c.bf16 %v3373_v52, %v3361_v11 }
 0x27c   :  { %v1235_v12 = vpack.i.b16 %v1218_v18, %v1218_v18  ;;  %v1242_v20 = vpack.i.b16 %v1219_v10, %v1219_v10  ;;  %v1228_v40 = vpack.i.b16 %v1217_v35, %v1217_v35  ;;  %v1221_v55 = vpack.i.b16 %v1216_v25, %v1216_v25 }
 0x27d   :  { %v1182_v50 = vrot.slane %v1174_v0, %v3301_v37  ;;  %v1189_v48 = vrot.slane %v1175_v17, %v3301_v37  ;;  %v3899_v17 = vpack.c.bf16 %v3363_v15, %v3355_v42  ;;  %v3901_v11 = vpack.c.bf16 %v3431_v29, %v3401_v60 }
 0x27e   :  { %v3559_v39 = vrot.slane %v1235_v12, %v3309_v44  ;;  %v1247_v22 = vrot.slane %v1242_v20, %v3309_v44  ;;  %v1233_v38 = vrot.slane %v1228_v40, %v3309_v44  ;;  %v3564_v8 = vrot.slane %v1221_v55, %v3309_v44 }
 0x27f   :  { %v1190_v13 = vcombine.low %v1182_v50, %v1189_v48  ;;  %v3900_v48 = vpack.c.bf16 %v3365_v46, %v3357_v43  ;;  %v3902_v42 = vpack.c.bf16 %v3433_v30, %v3403_v4  ;;  %v3903_v12 = vmov 0  }
 0x280   :  { %v1249_v36 = vmul.bf16 %v1233_v38, %v3897_v58  ;;  %v1251_v0 = vmul.bf16 %v1247_v22, %v3898_v49  ;;  %v1248_v50 = vmul.bf16 %v3564_v8, %v3899_v17  ;;  %v1253_v52 = vmul.bf16 %v1233_v38, %v3901_v11 }
 0x281   :  { %v1197_v57 = vrot.slane %v1190_v13, %v3301_v37  ;;  %v1250_v18 = vmul.bf16 %v3559_v39, %v3900_v48  ;;  %v1255_v15 = vmul.bf16 %v1247_v22, %v3902_v42  ;;  %v3904_v29 = vpack.c.bf16 %v3415_v32, %v3385_v61  ;;  %v3912_v48 = vld [vmem:[#allocation16_spill] sm:$0xff] }
 0x283   :  { %v1199_v41 = vsub.f32 %v950_v54, %v1197_v57  ;;  %v1252_v30 = vmul.bf16 %v3564_v8, %v3904_v29  ;;  %v2972_v29 = vld [vmem:[#allocation6 + $0x40] sm:$0xff]  }
 0x285   :  { %v1276_v6 = vrot.slane %v1199_v41, %v1156_v1  ;;  %v1272_v23 = vrot.slane %v1199_v41, %v3312_v45  ;;  %v1280_v59 = vrot.slane %v1199_v41, %v1160_v47  ;;  %v1268_v21 = vrot.slane %v1199_v41, %v3309_v44 }
 0x287   :  { %v1287_v28 = vpack.c.bf16 %v1276_v6, %v1276_v6  ;;  %v1286_v5 = vpack.c.bf16 %v1272_v23, %v1272_v23  ;;  %v1288_v14 = vpack.c.bf16 %v1280_v59, %v1280_v59  ;;  %v1285_v7 = vpack.c.bf16 %v1268_v21, %v1268_v21 }
 0x288   :  { %v3905_v6 = vpack.c.bf16 %v3417_v33, %v3387_v63  ;;  %v3906_v59 = vpack.c.bf16 %v3483_v26, %v3456_v2  ;;  %v1213_v33 = vpack.c.bf16 %v3533_v53, %v3507_v31 }
 0x289   :  { %v1304_v1 = vpack.i.b16 %v1287_v28, %v1287_v28  ;;  %v1297_v19 = vpack.i.b16 %v1286_v5, %v1286_v5  ;;  %v1311_v56 = vpack.i.b16 %v1288_v14, %v1288_v14  ;;  %v1290_v47 = vpack.i.b16 %v1285_v7, %v1285_v7 }
 0x28a   :  { %v1254_v23 = vmul.bf16 %v3559_v39, %v3905_v6  ;;  %v1257_v21 = vmul.bf16 %v1233_v38, %v3906_v59  ;;  %v3907_v28 = vpack.c.bf16 %v3485_v27, %v3458_v3  ;;  %v3908_v3 = vpack.c.bf16 %v3469_v16, %v3445_v34 }
 0x28b   :  { %v1302_v10 = vrot.slane %v1297_v19, %v3309_v44  ;;  %v1316_v35 = vrot.slane %v1311_v56, %v3309_v44  ;;  %v1295_v62 = vrot.slane %v1290_v47, %v3309_v44  ;;  %v1309_v51 = vrot.slane %v1304_v1, %v3309_v44  ;;  %v3909_v56 = vld [vmem:[#allocation13_spill] sm:$0xff]  ;;  %v3910_v47 = vld [vmem:[#allocation12_spill] sm:$0xff] }
 0x28c   :  { %v1259_v5 = vmul.bf16 %v1247_v22, %v3907_v28  ;;  %v1215_v19 = vpack.c.bf16 %v3535_v9, %v3509_v24  ;;  %v1256_v27 = vmul.bf16 %v3564_v8, %v3908_v3  ;;  %v3911_v58 = vpack.c.bf16 %v3909_v56, %v3910_v47 }
 0x28d   :  { %v1318_v25 = vadd.bf16 %v1302_v10, %v1249_v36  ;;  %v1320_v43 = vadd.bf16 %v1316_v35, %v1251_v0  ;;  %v1317_v46 = vadd.bf16 %v1295_v62, %v1248_v50  ;;  %v1319_v13 = vadd.bf16 %v1309_v51, %v1250_v18  ;;  %v3913_v18 = vld [vmem:[#allocation14_spill] sm:$0xff] }
 0x28e   :  { %v1322_v54 = vadd.bf16 %v1302_v10, %v1253_v52  ;;  %v1324_v57 = vadd.bf16 %v1316_v35, %v1255_v15  ;;  %v1321_v14 = vadd.bf16 %v1295_v62, %v1252_v30  ;;  %v1323_v7 = vadd.bf16 %v1309_v51, %v1254_v23  ;;  %v3916_v52 = vld [vmem:[#allocation15_spill] sm:$0xff] }
 0x28f   :  { %v1334_v20 = vmax.bf16 %v3903_v12, %v1318_v25  ;;  %v1336_v40 = vmax.bf16 %v3903_v12, %v1320_v43  ;;  %v1333_v55 = vmax.bf16 %v3903_v12, %v1317_v46  ;;  %v1335_v41 = vmax.bf16 %v3903_v12, %v1319_v13  ;;  %v2958_v46 = vld [vmem:[#allocation6 + $0x78] sm:$0xff]   ;;  %v2973_v30 = vld [vmem:[#allocation6] sm:$0xff]  }
 0x290   :  { %v1338_v60 = vmax.bf16 %v3903_v12, %v1322_v54  ;;  %v1340_v4 = vmax.bf16 %v3903_v12, %v1324_v57  ;;  %v1326_v61 = vadd.bf16 %v1302_v10, %v1257_v21  ;;  %v1328_v32 = vadd.bf16 %v1316_v35, %v1259_v5  ;;  %v2959_v13 = vld [vmem:[#allocation6 + $0x38] sm:$0xff]   ;;  %2672 = vmatprep.subr.bf16.mxu1 %v2958_v46  ;;  %v2961_v54 = vld [vmem:[#allocation6 + $0x30] sm:$0xff]   ;;  %v2962_v57 = vld [vmem:[#allocation6 + $0x68] sm:$0xff]  }
 0x291   :  { %1765 = vmatprep.mubr.bf16.mxu1 %v1334_v20  ;;  %1838 = vmatprep.mubr.bf16.mxu0 %v1336_v40  ;;  %v1337_v1 = vmax.bf16 %v3903_v12, %v1321_v14  ;;  %v1339_v63 = vmax.bf16 %v3903_v12, %v1323_v7  ;;  %v1258_v36 = vmul.bf16 %v3559_v39, %v3911_v58  ;;  %v2964_v20 = vld [vmem:[#allocation6 + $0x60] sm:$0xff]   ;;  %v2967_v40 = vld [vmem:[#allocation6 + $0x18] sm:$0xff]  }
 0x292   :  { %1766 = vmatmul.mubr.bf16.vlgmr.msra.gmra.mxu1 %v1333_v55  ;;  %1839 = vmatmul.mubr.bf16.vlgmr.msra.gmra.mxu0 %v1335_v41  ;;  %v1342_v2 = vmax.bf16 %v3903_v12, %v1326_v61  ;;  %v1344_v26 = vmax.bf16 %v3903_v12, %v1328_v32  ;;  %v1263_v53 = vmul.bf16 %v1247_v22, %v1215_v19  ;;  %v2968_v55 = vld [vmem:[#allocation6 + $0x50] sm:$0xff]  }
 0x293   :  { %1775 = vmatprep.mubr.bf16.mxu1 %v1338_v60  ;;  %1848 = vmatprep.mubr.bf16.mxu0 %v1340_v4  ;;  %v1261_v24 = vmul.bf16 %v1233_v38, %v1213_v33  ;;  %v1325_v31 = vadd.bf16 %v1295_v62, %v1256_v27  ;;  %v1327_v9 = vadd.bf16 %v1309_v51, %v1258_v36  ;;  %v3915_v38 = vld [vmem:[#allocation17_spill] sm:$0xff]  ;;  %v2970_v60 = vld [vmem:[#allocation6 + $0x48] sm:$0xff]  }
 0x294   :  { %v1332_v0 = vadd.bf16 %v1316_v35, %v1263_v53  ;;  %v3914_v22 = vpack.c.bf16 %v3912_v48, %v3913_v18  ;;  %v3917_v42 = vpack.c.bf16 %v3915_v38, %v3916_v52  ;;  %2673 = vmatpush3.bf16.msra.mxu1 %v2959_v13  ;;  %v2969_v41 = vld [vmem:[#allocation6 + $0x10] sm:$0xff]   ;;  %v2971_v4 = vld [vmem:[#allocation6 + $0x8] sm:$0xff]  }
 0x295   :  { %v1330_v49 = vadd.bf16 %v1302_v10, %v1261_v24  ;;  %v1341_v17 = vmax.bf16 %v3903_v12, %v1325_v31  ;;  %v1343_v50 = vmax.bf16 %v3903_v12, %v1327_v9 }
 0x296   :  { %v1348_v16 = vmax.bf16 %v3903_v12, %v1332_v0  ;;  %v1260_v11 = vmul.bf16 %v3564_v8, %v3914_v22  ;;  %v1262_v10 = vmul.bf16 %v3559_v39, %v3917_v42  ;;  %v2960_v8 = vld [vmem:[#allocation6 + $0x70] sm:$0xff]   ;;  %v2963_v39 = vld [vmem:[#allocation6 + $0x28] sm:$0xff]  }
 0x297   :  { %v1346_v34 = vmax.bf16 %v3903_v12, %v1330_v49  ;;  %2674 = vmatprep.subr.bf16.mxu1 %v2960_v8 }
 0x298   :  { %v1329_v35 = vadd.bf16 %v1295_v62, %v1260_v11  ;;  %v1331_v15 = vadd.bf16 %v1309_v51, %v1262_v10  ;;  %2675 = vmatpush3.bf16.msra.mxu1 %v2961_v54  ;;  %v2965_v62 = vld [vmem:[#allocation6 + $0x20] sm:$0xff]   ;;  %v2966_v51 = vld [vmem:[#allocation6 + $0x58] sm:$0xff]  }
 0x299   :  { %2676 = vmatprep.subr.bf16.mxu1 %v2962_v57 }
 0x29a   :  { %1776 = vmatmul.mubr.bf16.gmra.mxu1 %v1337_v1  ;;  %1849 = vmatmul.mubr.bf16.gmra.mxu0 %v1339_v63  ;;  %v1345_v25 = vmax.bf16 %v3903_v12, %v1329_v35  ;;  %v1347_v43 = vmax.bf16 %v3903_v12, %v1331_v15 }
 0x29b   :  { %1785 = vmatprep.mubr.bf16.mxu1 %v1342_v2  ;;  %1858 = vmatprep.mubr.bf16.mxu0 %v1344_v26 }
 0x29c   :  { %2677 = vmatpush3.bf16.msra.mxu1 %v2963_v39 }
 0x29d   :  { %2678 = vmatprep.subr.bf16.mxu1 %v2964_v20 }
 0x2a0   :  { %2679 = vmatpush3.bf16.msra.mxu1 %v2965_v62 }
 0x2a1   :  { %2680 = vmatprep.subr.bf16.mxu1 %v2966_v51 }
 0x2a2   :  { %1786 = vmatmul.mubr.bf16.gmra.mxu1 %v1341_v17  ;;  %1859 = vmatmul.mubr.bf16.gmra.mxu0 %v1343_v50 }
 0x2a3   :  { %1795 = vmatprep.mubr.bf16.mxu1 %v1346_v34  ;;  %1868 = vmatprep.mubr.bf16.mxu0 %v1348_v16 }
 0x2a4   :  { %2681 = vmatpush3.bf16.msra.mxu1 %v2967_v40 }
 0x2a5   :  { %2682 = vmatprep.subr.bf16.mxu1 %v2968_v55 }
 0x2a8   :  { %2683 = vmatpush3.bf16.msra.mxu1 %v2969_v41 }
 0x2a9   :  { %2684 = vmatprep.subr.bf16.mxu1 %v2970_v60 }
 0x2aa   :  { %1796 = vmatmul.mubr.bf16.gmra.mxu1 %v1345_v25  ;;  %1869 = vmatmul.mubr.bf16.gmra.mxu0 %v1347_v43 }
 0x2ac   :  { %2685 = vmatpush3.bf16.msra.mxu1 %v2971_v4 }
 0x2ad   :  { %2686 = vmatprep.subr.bf16.mxu1 %v2972_v29 }
 0x2b0   :  { %2687 = vmatpush3.bf16.msra.mxu1 %v2973_v30 }
 0x352   :  { %v1767_v6 = vpop.f32.mrf.mxu1  ;;  %v1840_v23 = vpop.f32.mrf.mxu0 }
 0x353   :  { %v3640_v14 = vadd.f32 %v1840_v23, %v1767_v6 }
 0x354   :  { %v1769_v59 = vpop.f32.mrf.mxu1  ;;  %v1842_v21 = vpop.f32.mrf.mxu0 }
 0x355   :  { %v3644_v1 = vadd.f32 %v1842_v21, %v1769_v59  ;;  %v1909_v18 = vmul.f32 %v3640_v14, %v3640_v14 }
 0x356   :  { %v1771_v28 = vpop.f32.mrf.mxu1  ;;  %v1844_v5 = vpop.f32.mrf.mxu0 }
 0x357   :  { %v3642_v7 = vadd.f32 %v1844_v5, %v1771_v28  ;;  %v1910_v46 = vmul.f32 %v3644_v1, %v3644_v1 }
 0x358   :  { %v1773_v61 = vpop.f32.mrf.mxu1  ;;  %v1846_v32 = vpop.f32.mrf.mxu0 }
 0x359   :  { %v2014_v63 = vpack.c.bf16 %v3642_v7, %v3640_v14  ;;  %v3648_v33 = vadd.f32 %v1846_v32, %v1773_v61  ;;  %v1911_v50 = vmul.f32 %v3642_v7, %v3642_v7  ;;  %v1881_v22 = vadd.f32 %v3642_v7, %v3640_v14 }
 0x35a   :  { %v1777_v19 = vpop.f32.mrf.mxu1  ;;  %v1850_v2 = vpop.f32.mrf.mxu0 }
 0x35b   :  { %v2015_v26 = vpack.c.bf16 %v3648_v33, %v3644_v1  ;;  %v3652_v58 = vadd.f32 %v1850_v2, %v1777_v19  ;;  %v1912_v52 = vmul.f32 %v3648_v33, %v3648_v33  ;;  %v1925_v35 = vadd.f32 %v1911_v50, %v1909_v18 }
 0x35c   :  { %v1779_v3 = vpop.f32.mrf.mxu1  ;;  %v1852_v27 = vpop.f32.mrf.mxu0  ;;  %v1894_v13 = vadd.f32 %v3648_v33, %v3644_v1 }
 0x35d   :  { %v3658_v9 = vadd.f32 %v1852_v27, %v1779_v3  ;;  %v1913_v11 = vmul.f32 %v3652_v58, %v3652_v58  ;;  %v1882_v15 = vadd.f32 %v1881_v22, %v3652_v58  ;;  %v1938_v55 = vadd.f32 %v1912_v52, %v1910_v46 }
 0x35e   :  { %v1781_v56 = vpop.f32.mrf.mxu1  ;;  %v1854_v47 = vpop.f32.mrf.mxu0 }
 0x35f   :  { %v3654_v36 = vadd.f32 %v1854_v47, %v1781_v56  ;;  %v1914_v8 = vmul.f32 %v3658_v9, %v3658_v9  ;;  %v1926_v20 = vadd.f32 %v1925_v35, %v1913_v11  ;;  %v1895_v41 = vadd.f32 %v1894_v13, %v3658_v9 }
 0x360   :  { %v1783_v53 = vpop.f32.mrf.mxu1  ;;  %v1856_v24 = vpop.f32.mrf.mxu0 }
 0x361   :  { %v2016_v31 = vpack.c.bf16 %v3654_v36, %v3652_v58  ;;  %v3660_v49 = vadd.f32 %v1856_v24, %v1783_v53  ;;  %v1915_v25 = vmul.f32 %v3654_v36, %v3654_v36  ;;  %v1883_v62 = vadd.f32 %v1882_v15, %v3654_v36 }
 0x362   :  { %v1787_v0 = vpop.f32.mrf.mxu1  ;;  %v1860_v17 = vpop.f32.mrf.mxu0  ;;  %v1939_v28 = vadd.f32 %v1938_v55, %v1914_v8 }
 0x363   :  { %v2017_v34 = vpack.c.bf16 %v3660_v49, %v3658_v9  ;;  %v3672_v38 = vadd.f32 %v1860_v17, %v1787_v0  ;;  %v1916_v60 = vmul.f32 %v3660_v49, %v3660_v49  ;;  %v1927_v6 = vadd.f32 %v1926_v20, %v1915_v25 }
 0x364   :  { %v1789_v16 = vpop.f32.mrf.mxu1  ;;  %v1862_v48 = vpop.f32.mrf.mxu0  ;;  %v1896_v5 = vadd.f32 %v1895_v41, %v3660_v49 }
 0x365   :  { %v3687_v54 = vadd.f32 %v1862_v48, %v1789_v16  ;;  %v1917_v51 = vmul.f32 %v3672_v38, %v3672_v38  ;;  %v1884_v23 = vadd.f32 %v1883_v62, %v3672_v38  ;;  %v1940_v53 = vadd.f32 %v1939_v28, %v1916_v60 }
 0x366   :  { %v1791_v42 = vpop.f32.mrf.mxu1  ;;  %v1864_v10 = vpop.f32.mrf.mxu0 }
 0x367   :  { %v3679_v43 = vadd.f32 %v1864_v10, %v1791_v42  ;;  %v1918_v61 = vmul.f32 %v3687_v54, %v3687_v54  ;;  %v1928_v3 = vadd.f32 %v1927_v6, %v1917_v51  ;;  %v1897_v24 = vadd.f32 %v1896_v5, %v3687_v54 }
 0x368   :  { %v1793_v57 = vpop.f32.mrf.mxu1  ;;  %v1866_v39 = vpop.f32.mrf.mxu0 }
 0x369   :  { %v2018_v40 = vpack.c.bf16 %v3679_v43, %v3672_v38  ;;  %v3697_v4 = vadd.f32 %v1866_v39, %v1793_v57  ;;  %v1919_v59 = vmul.f32 %v3679_v43, %v3679_v43  ;;  %v1885_v27 = vadd.f32 %v1884_v23, %v3679_v43  ;;  %v2974_v43 = vld [vmem:[%s3878_s5 + $0x38] sm:$0xff]  }
 0x36a   :  { %v1797_v29 = vpop.f32.mrf.mxu1  ;;  %v1870_v30 = vpop.f32.mrf.mxu0  ;;  %v1941_v22 = vadd.f32 %v1940_v53, %v1918_v61  ;;  %2724 = vmatprep.subr.bf16.mxu0 %v2974_v43 }
 0x36b   :  { %v3702_v21 = vadd.f32 %v1870_v30, %v1797_v29  ;;  %v2019_v32 = vpack.c.bf16 %v3697_v4, %v3687_v54  ;;  %v1920_v0 = vmul.f32 %v3697_v4, %v3697_v4  ;;  %v1929_v16 = vadd.f32 %v1928_v3, %v1919_v59  ;;  %2725 = vmatpush3.bf16.msra.mxu0 %v2974_v43 }
 0x36c   :  { %v1799_v19 = vpop.f32.mrf.mxu1  ;;  %v1872_v2 = vpop.f32.mrf.mxu0  ;;  %v1898_v11 = vadd.f32 %v1897_v24, %v3697_v4 }
 0x36d   :  { %v1921_v56 = vmul.f32 %v3702_v21, %v3702_v21  ;;  %v3712_v47 = vadd.f32 %v1872_v2, %v1799_v19  ;;  %v1886_v48 = vadd.f32 %v1885_v27, %v3702_v21  ;;  %v1942_v13 = vadd.f32 %v1941_v22, %v1920_v0 }
 0x36e   :  { %v1801_v17 = vpop.f32.mrf.mxu1  ;;  %v1874_v50 = vpop.f32.mrf.mxu0 }
 0x36f   :  { %v3718_v18 = vadd.f32 %v1874_v50, %v1801_v17  ;;  %v1922_v52 = vmul.f32 %v3712_v47, %v3712_v47  ;;  %v1930_v35 = vadd.f32 %v1929_v16, %v1921_v56  ;;  %v1899_v8 = vadd.f32 %v1898_v11, %v3712_v47 }
 0x370   :  { %v1803_v42 = vpop.f32.mrf.mxu1  ;;  %v1876_v10 = vpop.f32.mrf.mxu0 }
 0x371   :  { %v1887_v15 = vadd.f32 %v1886_v48, %v3718_v18  ;;  %v1923_v25 = vmul.f32 %v3718_v18, %v3718_v18  ;;  %v2020_v46 = vpack.c.bf16 %v3718_v18, %v3702_v21  ;;  %v3729_v57 = vadd.f32 %v1876_v10, %v1803_v42  ;;  %v2976_v21 = vld [vmem:[%s3878_s5 + $0x28] sm:$0xff]   ;;  %v2978_v18 = vld [vmem:[%s3878_s5 + $0x18] sm:$0xff]  }
 0x372   :  { %v1943_v62 = vadd.f32 %v1942_v13, %v1922_v52 }
 0x373   :  { %v1888_v39 = vrot.slane %v1887_v15, 4  ;;  %v1931_v20 = vadd.f32 %v1930_v35, %v1923_v25  ;;  %v1900_v51 = vadd.f32 %v1899_v8, %v3729_v57  ;;  %v1924_v55 = vmul.f32 %v3729_v57, %v3729_v57 }
 0x374   :  { %v2021_v41 = vpack.c.bf16 %v3729_v57, %v3712_v47  ;;  %v2977_v47 = vld [vmem:[%s3878_s5 + $0x20] sm:$0xff]   ;;  %v2980_v57 = vld [vmem:[%s3878_s5 + $0x8] sm:$0xff]  }
 0x375   :  { %v1889_v60 = vadd.f32 %v1888_v39, %v1887_v15  ;;  %v1932_v29 = vrot.slane %v1931_v20, 4  ;;  %v1901_v30 = vrot.slane %v1900_v51, 4  ;;  %v1944_v6 = vadd.f32 %v1943_v62, %v1924_v55 }
 0x377   :  { %v1890_v23 = vrot.slane %v1889_v60, 2  ;;  %v1933_v59 = vadd.f32 %v1932_v29, %v1931_v20  ;;  %v1902_v28 = vadd.f32 %v1901_v30, %v1900_v51  ;;  %v1945_v5 = vrot.slane %v1944_v6, 4 }
 0x379   :  { %v1891_v61 = vadd.f32 %v1890_v23, %v1889_v60  ;;  %v1934_v19 = vrot.slane %v1933_v59, 2  ;;  %v1903_v2 = vrot.slane %v1902_v28, 2  ;;  %v1946_v3 = vadd.f32 %v1945_v5, %v1944_v6  ;;  %v1879_v23 = vld [vmem:[%s3879_s6 + $0x6] sm:$0x3] }
 0x37b   :  { %v1892_v27 = vrot.slane %v1891_v61, 1  ;;  %v1935_v56 = vadd.f32 %v1934_v19, %v1933_v59  ;;  %v1904_v53 = vadd.f32 %v1903_v2, %v1902_v28  ;;  %v1947_v24 = vrot.slane %v1946_v3, 2 }
 0x37d   :  { %v1893_v0 = vadd.f32 %v1892_v27, %v1891_v61  ;;  %v1936_v17 = vrot.slane %v1935_v56, 1  ;;  %v1905_v50 = vrot.slane %v1904_v53, 1  ;;  %v1948_v16 = vadd.f32 %v1947_v24, %v1946_v3  ;;  %v1880_v24 = vld [vmem:[#allocation7 + $0x6] sm:$0x3] }
 0x37f   :  { %v1907_v48 = vmul.f32 0.015625, %v1893_v0  ;;  %v1937_v22 = vadd.f32 %v1936_v17, %v1935_v56  ;;  %v1906_v11 = vadd.f32 %v1905_v50, %v1904_v53  ;;  %v1949_v52 = vrot.slane %v1948_v16, 1 }
 0x381   :  { %v1951_v42 = vmul.f32 0.015625, %v1937_v22  ;;  %v1953_v10 = vmul.f32 %v1907_v48, %v1907_v48  ;;  %v1908_v35 = vmul.f32 0.015625, %v1906_v11  ;;  %v1950_v15 = vadd.f32 %v1949_v52, %v1948_v16 }
 0x383   :  { %v1955_v25 = vsub.f32 %v1951_v42, %v1953_v10  ;;  %v1952_v13 = vmul.f32 0.015625, %v1950_v15  ;;  %v1954_v8 = vmul.f32 %v1908_v35, %v1908_v35 }
 0x385   :  { %v1957_v39 = vmax.f32 %v1955_v25, 0.0  ;;  %v1956_v20 = vsub.f32 %v1952_v13, %v1954_v8 }
 0x387   :  { %v1959_v62 = vadd.f32 1e-05, %v1957_v39  ;;  %v1958_v51 = vmax.f32 %v1956_v20, 0.0 }
 0x389   :  { %v1960_v55 = vadd.f32 1e-05, %v1958_v51  ;;  %2994 = vrsqrt.f32 %v1959_v62 }
 0x38b   :  { %2996 = vrsqrt.f32 %v1960_v55 }
 0x396   :  { %v2995_v60 = vpop.eup %2994 }
 0x398   :  { %v2997_v29 = vpop.eup %2996 }
 0x399   :  { %v1965_v30 = vcombine.low %v2995_v60, %v2997_v29 }
 0x39b   :  { %v1972_v6 = vrot.slane %v1965_v30, %v3301_v37 }
 0x39d   :  { %v1979_v59 = vrot.slane %v1972_v6, %v3301_v37 }
 0x39f   :  { %v1981_v28 = vmul.f32 %v1979_v59, %v1879_v23 }
 0x3a1   :  { %v1986_v5 = vrot.slane %v1981_v28, %v3309_v44  ;;  %v1990_v61 = vrot.slane %v1981_v28, %v3312_v45 }
 0x3a3   :  { %v1993_v19 = vmul.f32 %v1986_v5, %v1907_v48  ;;  %v1994_v2 = vmul.f32 %v1990_v61, %v1908_v35  ;;  %v2023_v27 = vpack.c.bf16 %v1990_v61, %v1990_v61  ;;  %v2022_v53 = vpack.c.bf16 %v1986_v5, %v1986_v5 }
 0x3a5   :  { %v1997_v3 = vcombine.low %v1993_v19, %v1994_v2  ;;  %v2032_v17 = vpack.i.b16 %v2023_v27, %v2023_v27  ;;  %v2025_v50 = vpack.i.b16 %v2022_v53, %v2022_v53 }
 0x3a7   :  { %v2004_v56 = vrot.slane %v1997_v3, %v3301_v37  ;;  %v2037_v52 = vrot.slane %v2032_v17, %v3309_v44  ;;  %v2030_v10 = vrot.slane %v2025_v50, %v3309_v44 }
 0x3a9   :  { %v2011_v0 = vrot.slane %v2004_v56, %v3301_v37  ;;  %v2039_v25 = vmul.bf16 %v2037_v52, %v2015_v26  ;;  %v2038_v13 = vmul.bf16 %v2030_v10, %v2014_v63  ;;  %v2041_v8 = vmul.bf16 %v2037_v52, %v2017_v34 }
 0x3aa   :  { %v2040_v14 = vmul.bf16 %v2030_v10, %v2016_v31  ;;  %v2043_v7 = vmul.bf16 %v2037_v52, %v2019_v32  ;;  %v2042_v34 = vmul.bf16 %v2030_v10, %v2018_v40  ;;  %v2045_v58 = vmul.bf16 %v2037_v52, %v2021_v41  ;;  %v2975_v40 = vld [vmem:[%s3878_s5 + $0x30] sm:$0xff]   ;;  %v2981_v41 = vld [vmem:[%s3878_s5] sm:$0xff]  }
 0x3ab   :  { %v2013_v16 = vsub.f32 %v1880_v24, %v2011_v0  ;;  %v2044_v32 = vmul.bf16 %v2030_v10, %v2020_v46  ;;  %2726 = vmatprep.subr.bf16.mxu0 %v2975_v40  ;;  %v2979_v46 = vld [vmem:[%s3878_s5 + $0x10] sm:$0xff]  }
 0x3ac   :  { %2727 = vmatpush3.bf16.msra.mxu0 %v2975_v40 }
 0x3ad   :  { %v2050_v22 = vrot.slane %v2013_v16, %v3309_v44  ;;  %v2054_v11 = vrot.slane %v2013_v16, %v3312_v45  ;;  %2728 = vmatprep.subr.bf16.mxu0 %v2976_v21 }
 0x3af   :  { %v2057_v42 = vpack.c.bf16 %v2050_v22, %v2050_v22  ;;  %v2058_v48 = vpack.c.bf16 %v2054_v11, %v2054_v11 }
 0x3b0   :  { %2729 = vmatpush3.bf16.msra.mxu0 %v2976_v21 }
 0x3b1   :  { %v2060_v35 = vpack.i.b16 %v2057_v42, %v2057_v42  ;;  %v2067_v15 = vpack.i.b16 %v2058_v48, %v2058_v48  ;;  %2730 = vmatprep.subr.bf16.mxu0 %v2977_v47 }
 0x3b3   :  { %v2072_v37 = vrot.slane %v2067_v15, %v3309_v44  ;;  %v2065_v45 = vrot.slane %v2060_v35, %v3309_v44 }
 0x3b4   :  { %2731 = vmatpush3.bf16.msra.mxu0 %v2977_v47 }
 0x3b5   :  { %v2074_v39 = vadd.bf16 %v2072_v37, %v2039_v25  ;;  %v2073_v20 = vadd.bf16 %v2065_v45, %v2038_v13  ;;  %v2076_v62 = vadd.bf16 %v2072_v37, %v2041_v8  ;;  %v2075_v63 = vadd.bf16 %v2065_v45, %v2040_v14  ;;  %2732 = vmatprep.subr.bf16.mxu0 %v2978_v18 }
 0x3b6   :  { %v2078_v26 = vadd.bf16 %v2072_v37, %v2043_v7  ;;  %v2077_v36 = vadd.bf16 %v2065_v45, %v2042_v34  ;;  %v2080_v31 = vadd.bf16 %v2072_v37, %v2045_v58  ;;  %v2079_v55 = vadd.bf16 %v2065_v45, %v2044_v32 }
 0x3b7   :  { %v2082_v51 = vmax.bf16 %v3903_v12, %v2074_v39  ;;  %v2081_v1 = vmax.bf16 %v3903_v12, %v2073_v20  ;;  %v2084_v33 = vmax.bf16 %v3903_v12, %v2076_v62  ;;  %v2083_v9 = vmax.bf16 %v3903_v12, %v2075_v63 }
 0x3b8   :  { %v2086_v49 = vmax.bf16 %v3903_v12, %v2078_v26  ;;  %v2085_v54 = vmax.bf16 %v3903_v12, %v2077_v36  ;;  %v2088_v4 = vmax.bf16 %v3903_v12, %v2080_v31  ;;  %v2087_v38 = vmax.bf16 %v3903_v12, %v2079_v55  ;;  %2733 = vmatpush3.bf16.msra.mxu0 %v2978_v18 }
 0x3b9   :  { %2249 = vmatprep.mubr.bf16.mxu1 %v2082_v51  ;;  %2734 = vmatprep.subr.bf16.mxu0 %v2979_v46 }
 0x3ba   :  { %2250 = vmatmul.mubr.bf16.vlgmr.msra.gmra.mxu1 %v2081_v1 }
 0x3bb   :  { %2257 = vmatprep.mubr.bf16.mxu1 %v2084_v33 }
 0x3bc   :  { %2735 = vmatpush3.bf16.msra.mxu0 %v2979_v46 }
 0x3bd   :  { %2736 = vmatprep.subr.bf16.mxu0 %v2980_v57 }
 0x3c0   :  { %2737 = vmatpush3.bf16.msra.mxu0 %v2980_v57 }
 0x3c1   :  { %2738 = vmatprep.subr.bf16.mxu0 %v2981_v41 }
 0x3c2   :  { %2258 = vmatmul.mubr.bf16.gmra.mxu1 %v2083_v9 }
 0x3c3   :  { %2265 = vmatprep.mubr.bf16.mxu1 %v2086_v49 }
 0x3c4   :  { %2739 = vmatpush3.bf16.msra.mxu0 %v2981_v41 }
 0x3ca   :  { %2266 = vmatmul.mubr.bf16.gmra.mxu1 %v2085_v54 }
 0x3cb   :  { %2273 = vmatprep.mubr.bf16.mxu1 %v2088_v4 }
 0x3d2   :  { %2274 = vmatmul.mubr.bf16.gmra.mxu1 %v2087_v38 }
 0x47a   :  { %v2688_v60 = vpop.f32.mrf.mxu1 }
 0x47c   :  { %v2689_v29 = vpop.f32.mrf.mxu1 }
 0x47d   :  { %v3809_v2 = vadd.f32 %v2689_v29, %v2688_v60 }
 0x47e   :  { %v2691_v30 = vpop.f32.mrf.mxu1 }
 0x47f   :  { %v2298_v0 = vmul.f32 %v3809_v2, %v3809_v2 }
 0x480   :  { %v2692_v6 = vpop.f32.mrf.mxu1 }
 0x481   :  { %v3807_v61 = vadd.f32 %v2692_v6, %v2691_v30  ;;  %v2282_v30 = vld [vmem:[%s3879_s6 + $0x8] sm:$0x1] }
 0x482   :  { %v2694_v23 = vpop.f32.mrf.mxu1 }
 0x483   :  { %v2299_v56 = vmul.f32 %v3807_v61, %v3807_v61  ;;  %v2284_v17 = vadd.f32 %v3807_v61, %v3809_v2 }
 0x484   :  { %v2695_v59 = vpop.f32.mrf.mxu1 }
 0x485   :  { %v3811_v3 = vadd.f32 %v2695_v59, %v2694_v23  ;;  %v2306_v11 = vadd.f32 %v2299_v56, %v2298_v0  ;;  %v2283_v59 = vld [vmem:[#allocation7 + $0x8] sm:$0x1]  ;;  %v2328_v0 = vpack.c.bf16 %v3807_v61, %v3809_v2 }
 0x486   :  { %v2697_v28 = vpop.f32.mrf.mxu1 }
 0x487   :  { %v2300_v50 = vmul.f32 %v3811_v3, %v3811_v3  ;;  %v2285_v52 = vadd.f32 %v3811_v3, %v2284_v17 }
 0x488   :  { %v2698_v5 = vpop.f32.mrf.mxu1 }
 0x489   :  { %v3815_v53 = vadd.f32 %v2698_v5, %v2697_v28  ;;  %v2307_v35 = vadd.f32 %v2306_v11, %v2300_v50 }
 0x48a   :  { %v2700_v19 = vpop.f32.mrf.mxu1 }
 0x48b   :  { %v2301_v42 = vmul.f32 %v3815_v53, %v3815_v53  ;;  %v2286_v15 = vadd.f32 %v3815_v53, %v2285_v52  ;;  %v2329_v17 = vpack.c.bf16 %v3815_v53, %v3811_v3 }
 0x48c   :  { %v2701_v27 = vpop.f32.mrf.mxu1 }
 0x48d   :  { %v3823_v16 = vadd.f32 %v2701_v27, %v2700_v19  ;;  %v2308_v13 = vadd.f32 %v2307_v35, %v2301_v42 }
 0x48e   :  { %v2703_v24 = vpop.f32.mrf.mxu1 }
 0x48f   :  { %v2302_v25 = vmul.f32 %v3823_v16, %v3823_v16  ;;  %v2287_v45 = vadd.f32 %v3823_v16, %v2286_v15 }
 0x490   :  { %v2704_v22 = vpop.f32.mrf.mxu1 }
 0x491   :  { %v2705_v48 = vadd.f32 %v2704_v22, %v2703_v24  ;;  %v2309_v62 = vadd.f32 %v2308_v13, %v2302_v25 }
 0x492   :  { %v2706_v10 = vpop.f32.mrf.mxu1 }
 0x493   :  { %v2303_v8 = vmul.f32 %v2705_v48, %v2705_v48  ;;  %v2288_v51 = vadd.f32 %v2705_v48, %v2287_v45  ;;  %v2330_v50 = vpack.c.bf16 %v2705_v48, %v3823_v16 }
 0x494   :  { %v2707_v37 = vpop.f32.mrf.mxu1 }
 0x495   :  { %v2708_v39 = vadd.f32 %v2707_v37, %v2706_v10  ;;  %v2310_v14 = vadd.f32 %v2309_v62, %v2303_v8 }
 0x496   :  { %v2709_v20 = vpop.f32.mrf.mxu1 }
 0x497   :  { %v2304_v1 = vmul.f32 %v2708_v39, %v2708_v39  ;;  %v2289_v7 = vadd.f32 %v2708_v39, %v2288_v51 }
 0x498   :  { %v2710_v33 = vpop.f32.mrf.mxu1 }
 0x499   :  { %v2711_v63 = vadd.f32 %v2710_v33, %v2709_v20  ;;  %v2311_v26 = vadd.f32 %v2310_v14, %v2304_v1 }
 0x49b   :  { %v2290_v9 = vadd.f32 %v2711_v63, %v2289_v7  ;;  %v2305_v49 = vmul.f32 %v2711_v63, %v2711_v63  ;;  %v2331_v45 = vpack.c.bf16 %v2711_v63, %v2708_v39 }
 0x49d   :  { %v2291_v34 = vrot.slane %v2290_v9, 4  ;;  %v2312_v58 = vadd.f32 %v2311_v26, %v2305_v49 }
 0x49f   :  { %v2292_v36 = vadd.f32 %v2291_v34, %v2290_v9  ;;  %v2313_v31 = vrot.slane %v2312_v58, 4 }
 0x4a1   :  { %v2293_v54 = vrot.slane %v2292_v36, 2  ;;  %v2314_v4 = vadd.f32 %v2313_v31, %v2312_v58 }
 0x4a3   :  { %v2294_v32 = vadd.f32 %v2293_v54, %v2292_v36  ;;  %v2315_v55 = vrot.slane %v2314_v4, 2 }
 0x4a5   :  { %v2295_v38 = vrot.slane %v2294_v32, 1  ;;  %v2316_v43 = vadd.f32 %v2315_v55, %v2314_v4 }
 0x4a7   :  { %v2296_v40 = vadd.f32 %v2295_v38, %v2294_v32  ;;  %v2317_v21 = vrot.slane %v2316_v43, 1 }
 0x4a9   :  { %v2297_v47 = vmul.f32 0.015625, %v2296_v40  ;;  %v2318_v18 = vadd.f32 %v2317_v21, %v2316_v43 }
 0x4ab   :  { %v2319_v46 = vmul.f32 0.015625, %v2318_v18  ;;  %v2320_v57 = vmul.f32 %v2297_v47, %v2297_v47 }
 0x4ad   :  { %v2321_v41 = vsub.f32 %v2319_v46, %v2320_v57 }
 0x4af   :  { %v2322_v60 = vmax.f32 %v2321_v41, 0.0 }
 0x4b1   :  { %v2323_v29 = vadd.f32 1e-05, %v2322_v60 }
 0x4b3   :  { %2998 = vrsqrt.f32 %v2323_v29 }
 0x4c0   :  { %v2999_v6 = vpop.eup %2998 }
 0x4c1   :  { %v2325_v23 = vmul.f32 %v2999_v6, %v2282_v30 }
 0x4c3   :  { %v2326_v28 = vmul.f32 %v2325_v23, %v2297_v47  ;;  %v2332_v5 = vpack.c.bf16 %v2325_v23, %v2325_v23 }
 0x4c5   :  { %v2327_v19 = vsub.f32 %v2283_v59, %v2326_v28  ;;  %v2334_v27 = vpack.i.b16 %v2332_v5, %v2332_v5 }
 0x4c7   :  { %v2339_v56 = vrot.slane %v2334_v27, %v3309_v44  ;;  %v2344_v24 = vpack.c.bf16 %v2327_v19, %v2327_v19 }
 0x4c9   :  { %v2346_v22 = vpack.i.b16 %v2344_v24, %v2344_v24  ;;  %v2340_v11 = vmul.bf16 %v2339_v56, %v2328_v0  ;;  %v2341_v42 = vmul.bf16 %v2339_v56, %v2329_v17  ;;  %v2342_v10 = vmul.bf16 %v2339_v56, %v2330_v50 }
 0x4ca   :  { %v2343_v2 = vmul.bf16 %v2339_v56, %v2331_v45 }
 0x4cb   :  { %v2351_v52 = vrot.slane %v2346_v22, %v3309_v44  ;;  %v2663_v44 = vld [vmem:[%s3881_s8] ss:$0 sm:$0xff] }
 0x4cd   :  { %v2352_v35 = vadd.bf16 %v2351_v52, %v2340_v11  ;;  %v2353_v15 = vadd.bf16 %v2351_v52, %v2341_v42  ;;  %v2354_v25 = vadd.bf16 %v2351_v52, %v2342_v10  ;;  %v2355_v3 = vadd.bf16 %v2351_v52, %v2343_v2 }
 0x4cf   :  { %v2356_v37 = vmax.bf16 %v3903_v12, %v2352_v35  ;;  %v2357_v13 = vmax.bf16 %v3903_v12, %v2353_v15  ;;  %v2358_v61 = vmax.bf16 %v3903_v12, %v2354_v25  ;;  %v2359_v53 = vmax.bf16 %v3903_v12, %v2355_v3 }
 0x4d1   :  { %2740 = vmatprep.mubr.bf16.mxu0 %v2356_v37 }
 0x4d2   :  { %2741 = vmatmul.mubr.bf16.vlgmr.msra.gmra.mxu0 %v2357_v13 }
 0x4d3   :  { %2744 = vmatprep.mubr.bf16.mxu0 %v2358_v61 }
 0x4da   :  { %2745 = vmatmul.mubr.bf16.gmra.mxu0 %v2359_v53 }
 0x592   :  { %v2742_v16 = vpop.f32.mrf.mxu0 }
 0x593   :  { %v2474_v48 = vadd.f32 %v2742_v16, %v2663_v44 }
 0x594   :  { %v2465_v8 = vpop.f32.mrf.mxu0 }
 0x595   :  { %2498 = vst [vmem:[%s3882_s9 + $0x10] sm:$0xff] %v2474_v48  ;;  %v2466_v39 = vadd.f32 %v2663_v44, %v2465_v8 }
 0x596   :  { %v2743_v20 = vpop.f32.mrf.mxu0 }
 0x597   :  { %2496 = vst [vmem:[%s3882_s9] sm:$0xff] %v2466_v39  ;;  %v2477_v62 = vadd.f32 %v2743_v20, %v2663_v44 }
 0x598   :  { %v2468_v12 = vpop.f32.mrf.mxu0 }
 0x599   :  { %2499 = vst [vmem:[%s3882_s9 + $0x18] sm:$0xff] %v2477_v62  ;;  %v2469_v51 = vadd.f32 %v2663_v44, %v2468_v12 }
 0x59a   :  { %v2746_v1 = vpop.f32.mrf.mxu0 }
 0x59b   :  { %2497 = vst [vmem:[%s3882_s9 + $0x8] sm:$0xff] %v2469_v51  ;;  %v2490_v33 = vadd.f32 %v2746_v1, %v2663_v44 }
 0x59c   :  { %v2481_v14 = vpop.f32.mrf.mxu0 }
 0x59d   :  { %2502 = vst [vmem:[%s3882_s9 + $0x30] sm:$0xff] %v2490_v33  ;;  %v2482_v7 = vadd.f32 %v2663_v44, %v2481_v14 }
 0x59e   :  { %v2747_v63 = vpop.f32.mrf.mxu0 }
 0x59f   :  { %2500 = vst [vmem:[%s3882_s9 + $0x20] sm:$0xff] %v2482_v7  ;;  %v2493_v26 = vadd.f32 %v2747_v63, %v2663_v44 }
 0x5a0   :  { %v2484_v9 = vpop.f32.mrf.mxu0 }
 0x5a1   :  { %2503 = vst [vmem:[%s3882_s9 + $0x38] sm:$0xff] %v2493_v26  ;;  %v2485_v49 = vadd.f32 %v2663_v44, %v2484_v9 }
 0x5a3   :  { %2501 = vst [vmem:[%s3882_s9 + $0x28] sm:$0xff] %v2485_v49 }
 0x5a4   :  { %2508 = vsyncpa [#allocation3], 1 }
 0x5a5   :  { %2509 = vsyncpa [#allocation5], 1 }
 0x5a6   :  { %2510 = vsyncpa [#allocation8], 1 }

</bundles_post_ra>
